<compile_context>
chip_gen: v7x
topology: tpu7x:2x2x1
jax: 0.10.0
libtpu: 0.0.40
codegen_flags: <defaults>
</compile_context>

<pallas_src>
import numpy as np
import jax
import jax.numpy as jnp
from jax.experimental import pallas as pl
from jax.experimental.pallas import tpu as pltpu


# --------------------------------------------------------------------------- kernel
def genblock_kernel(x_ref, aff_ref, waff_ref,
                    ecin_s_ref, ecin_g_ref, ecout_s_ref, ecout_g_ref,
                    t1cat_ref, w0_ref, m1res_ref, t2cat_ref, m2cat_ref,
                    bout_ref, out_ref):
    f32 = jnp.float32
    N, H, WCin = x_ref.shape                     # x rows: (N, H, W*Cin)
    NHu, WuCout = out_ref.shape                  # out rows: (N*Hu, Wu*Cout)
    Hu = NHu // N
    Cin = ecin_g_ref.shape[1]
    Cout = ecout_g_ref.shape[1]
    P0 = N * H * (WCin // Cin)                   # elems per channel, pre-upsample (BN1)
    P1 = NHu * (WuCout // Cout)                  # elems per channel, post-upsample (BN2)
    eps = jnp.float32(1e-4)

    x3 = x_ref[...]                              # (N, H, W*Cin) lane-dense
    x2 = x3.reshape(N * H, WCin)
    aff = aff_ref[...]                           # (N, A)

    # -------- all four conditional gain/bias projections in ONE matmul
    affp = jnp.dot(aff, waff_ref[...], preferred_element_type=f32)   # (N, 2Cin+2Cout)
    gain1 = 1.0 + affp[:, 0:Cin]
    bias1 = affp[:, Cin:2 * Cin]
    gain2 = 1.0 + affp[:, 2 * Cin:2 * Cin + Cout]
    bias2 = affp[:, 2 * Cin + Cout:2 * Cin + 2 * Cout]

    # -------- CBN1 (batch stats on pre-upsample x, one pass) folded to scale/shift, ReLU
    csum = jnp.sum(x2, axis=0, keepdims=True)                    # (1, W*Cin)
    csq = jnp.sum(x2 * x2, axis=0, keepdims=True)
    stats1 = jnp.dot(jnp.concatenate([csum, csq], axis=0), ecin_g_ref[...],
                     preferred_element_type=f32) / P0            # (2, Cin)
    mean1 = stats1[0:1]
    var1 = stats1[1:2] - mean1 * mean1                           # biased var (PyTorch BN)
    inv1 = jax.lax.rsqrt(var1 + eps)
    scale1 = gain1 * inv1
    shift1 = bias1 - mean1 * scale1
    ss1 = jnp.dot(jnp.concatenate([scale1, shift1], axis=0), ecin_s_ref[...],
                  preferred_element_type=f32)                    # (2N, W*Cin)
    scale1r = ss1[:N]
    shift1r = ss1[N:]
    s_act = jnp.maximum(x3 * scale1r[:, None, :] + shift1r[:, None, :], 0.0)
    s2 = s_act.reshape(N * H, WCin)

    # -------- conv2d1 (3 ky taps merged) + residual 1x1, then ONE H-upsample/shift matmul.
    # t1cat: W-Toeplitz weights with W-upsample + horizontal taps + W-padding folded in,
    #        all three kernel rows concatenated along the output (lane) dim.
    # w0:    1x1 conv weight with the W-upsample folded in (applied to the raw input).
    # m1res: block matrix [m1[0] m1[1] m1[2]  0 ; 0 0 0 mres] -> top half of the result is
    #        the conv1 output, bottom half is the H-upsampled residual (no bias: conv1's
    #        bias is cancelled exactly by CBN2's mean subtraction).
    pk_all = jnp.dot(s2, t1cat_ref[...], preferred_element_type=f32)   # (N*H, 3*Wu*Cout)
    r0 = jnp.dot(x2, w0_ref[...], preferred_element_type=f32)          # (N*H, Wu*Cout)
    stacked = jnp.concatenate(
        [pk_all[:, 0:WuCout], pk_all[:, WuCout:2 * WuCout],
         pk_all[:, 2 * WuCout:3 * WuCout], r0], axis=0)                # (4*N*H, Wu*Cout)
    big = jnp.dot(m1res_ref[...], stacked, preferred_element_type=f32) # (2*N*Hu, Wu*Cout)
    y1 = big[:NHu]                                                     # conv1 output
    res_up = big[NHu:]                                                 # residual (upsampled)

    # -------- CBN2 (stats over conv1 output, one pass) folded, ReLU
    csum2 = jnp.sum(y1, axis=0, keepdims=True)                         # (1, Wu*Cout)
    csq2 = jnp.sum(y1 * y1, axis=0, keepdims=True)
    stats2 = jnp.dot(jnp.concatenate([csum2, csq2], axis=0), ecout_g_ref[...],
                     preferred_element_type=f32) / P1                  # (2, Cout)
    mean2 = stats2[0:1]
    var2 = stats2[1:2] - mean2 * mean2
    inv2 = jax.lax.rsqrt(var2 + eps)
    scale2 = gain2 * inv2
    shift2 = bias2 - mean2 * scale2
    ss2 = jnp.dot(jnp.concatenate([scale2, shift2], axis=0), ecout_s_ref[...],
                  preferred_element_type=f32)                          # (2N, Wu*Cout)
    scale2r = ss2[:N]
    shift2r = ss2[N:]
    y1_3 = y1.reshape(N, Hu, WuCout)
    h2 = jnp.maximum(y1_3 * scale2r[:, None, :] + shift2r[:, None, :], 0.0)
    h2 = h2.reshape(NHu, WuCout)

    # -------- conv2d2 (3 ky taps merged into one W-matmul + one H-shift matmul)
    qk_all = jnp.dot(h2, t2cat_ref[...], preferred_element_type=f32)   # (N*Hu, 3*Wu*Cout)
    stacked2 = jnp.concatenate(
        [qk_all[:, 0:WuCout], qk_all[:, WuCout:2 * WuCout],
         qk_all[:, 2 * WuCout:3 * WuCout]], axis=0)                    # (3*N*Hu, Wu*Cout)
    conv2 = jnp.dot(m2cat_ref[...], stacked2, preferred_element_type=f32)

    out_ref[...] = conv2 + res_up + bout_ref[...]                      # + (b2 + b0)


def genblock_forward(x_nhwc, affine, kp):
    N, H, W, Cin = x_nhwc.shape
    Hu, Wu = 2 * H, 2 * W
    WuCout = kp["w0big"].shape[1]
    Cout = WuCout // Wu
    A = affine.shape[1]
    NH, NHu, WCin = N * H, N * Hu, W * Cin
    x_rows = x_nhwc.reshape(N, H, WCin)                        # lane-dense input (free)

    args = (x_rows, affine,
            kp["w_aff"],
            kp["ecin_s"], kp["ecin_g"], kp["ecout_s"], kp["ecout_g"],
            kp["t1cat"], kp["w0big"], kp["m1res"], kp["t2cat"], kp["m2cat"],
            kp["boutrow"])

    # advisory cost estimate (dominant MXU matmuls + elementwise) and a VMEM limit sized
    # to the actual footprint (everything is single-invocation VMEM-resident).
    flops = 2 * (N * A * (2 * Cin + 2 * Cout)
                 + NH * WCin * (4 * WuCout)            # s2@t1cat + x2@w0big
                 + (2 * NHu) * (4 * NH) * WuCout       # m1res matmul
                 + NHu * WuCout * (3 * WuCout)         # h2@t2cat
                 + NHu * (3 * NHu) * WuCout            # m2cat matmul
                 ) + 12 * NHu * WuCout
    in_bytes = sum(int(np.prod(a.shape)) * 4 for a in args)
    out_bytes = NHu * WuCout * 4
    vmem_limit = int(min(64 * 1024 * 1024,
                         max(32 * 1024 * 1024, 4 * (in_bytes + out_bytes))))

    vmem = pl.BlockSpec(memory_space=pltpu.MemorySpace.VMEM)
    out2d = pl.pallas_call(
        genblock_kernel,
        out_shape=jax.ShapeDtypeStruct((NHu, WuCout), jnp.float32),   # lane-dense store
        in_specs=[vmem] * len(args),
        out_specs=vmem,
        compiler_params=pltpu.CompilerParams(vmem_limit_bytes=vmem_limit),
        cost_estimate=pl.CostEstimate(flops=flops, transcendentals=2 * (Cin + Cout),
                                      bytes_accessed=in_bytes + out_bytes),
    )(*args)
    return out2d.reshape(N, Hu, Wu, Cout)


# --------------------------------------------------------------------------- parameters
def _spectral_normalize(w):
    """Exact-sigma spectral normalization of an (out, ...) weight."""
    wn = np.asarray(w, dtype=np.float64)
    sigma = np.linalg.svd(wn.reshape(wn.shape[0], -1), compute_uv=False)[0]
    return jnp.asarray(wn / sigma, dtype=jnp.float32)


def init_params(key, Cin, Cout, A):
    ks = jax.random.split(key, 10)
    # CBN gain/bias linears (snlinear, bias=False); PyTorch weight layout (out, in)
    g1 = _spectral_normalize(0.2 * jax.random.normal(ks[0], (Cin, A)))
    b1 = _spectral_normalize(0.2 * jax.random.normal(ks[1], (Cin, A)))
    g2 = _spectral_normalize(0.2 * jax.random.normal(ks[2], (Cout, A)))
    b2 = _spectral_normalize(0.2 * jax.random.normal(ks[3], (Cout, A)))
    # convs (snconv2d, bias=True); PyTorch weight layout OIHW -> HWIO
    w1 = _spectral_normalize(0.2 * jax.random.normal(ks[4], (Cout, Cin, 3, 3)))
    w2 = _spectral_normalize(0.2 * jax.random.normal(ks[5], (Cout, Cout, 3, 3)))
    w0 = _spectral_normalize(0.2 * jax.random.normal(ks[6], (Cout, Cin, 1, 1)))
    bc1 = 0.1 * jax.random.normal(ks[7], (Cout,), jnp.float32)
    bc2 = 0.1 * jax.random.normal(ks[8], (Cout,), jnp.float32)
    bc0 = 0.1 * jax.random.normal(ks[9], (Cout,), jnp.float32)
    return dict(
        wg1=g1.T, wb1=b1.T, wg2=g2.T, wb2=b2.T,               # (A, C)
        w1_hwio=jnp.transpose(w1, (2, 3, 1, 0)),              # (3,3,Cin,Cout)
        w2_hwio=jnp.transpose(w2, (2, 3, 1, 0)),              # (3,3,Cout,Cout)
        w0_hwio=jnp.transpose(w0, (2, 3, 1, 0)),              # (1,1,Cin,Cout)
        b1=bc1, b2=bc2, b0=bc0,
    )


def pack_params(p, N, H, W, Cin, Cout):
    """Host-side, per-shape packing: fold nearest-2x upsampling, the 3x3 taps and all
    zero padding into constant matrices so the kernel is pure lane-dense matmul work.
    All three ky taps are concatenated so each conv is ONE W-matmul + ONE H-matmul."""
    Hu, Wu = 2 * H, 2 * W
    WCin, WuCout = W * Cin, Wu * Cout
    NH, NHu = N * H, N * Hu
    w1 = np.asarray(p["w1_hwio"], np.float32)
    w2 = np.asarray(p["w2_hwio"], np.float32)
    w0 = np.asarray(p["w0_hwio"], np.float32)

    # W-Toeplitz conv weights (conv1 has the W-upsample folded in)
    t1 = np.zeros((3, WCin, WuCout), np.float32)
    t2 = np.zeros((3, WuCout, WuCout), np.float32)
    for ky in range(3):
        for wu in range(Wu):
            for kx in range(3):
                ws = wu + kx - 1
                if 0 <= ws < Wu:
                    t1[ky, (ws // 2) * Cin:(ws // 2 + 1) * Cin,
                       wu * Cout:(wu + 1) * Cout] += w1[ky, kx]
                    t2[ky, ws * Cout:(ws + 1) * Cout,
                       wu * Cout:(wu + 1) * Cout] += w2[ky, kx]
    w0big = np.zeros((WCin, WuCout), np.float32)               # 1x1 conv + W-upsample
    for wu in range(Wu):
        w0big[(wu // 2) * Cin:(wu // 2 + 1) * Cin, wu * Cout:(wu + 1) * Cout] = w0[0, 0]

    # block-diagonal (per image) H-upsample / vertical-shift matrices (zero rows = H pad)
    m1 = np.zeros((3, NHu, NH), np.float32)
    m2 = np.zeros((3, NHu, NHu), np.float32)
    mres = np.zeros((NHu, NH), np.float32)
    for n in range(N):
        for j in range(Hu):
            mres[n * Hu + j, n * H + j // 2] = 1.0
            for ky in range(3):
                src = j + ky - 1
                if 0 <= src < Hu:
                    m1[ky, n * Hu + j, n * H + src // 2] = 1.0
                    m2[ky, n * Hu + j, n * Hu + src] = 1.0

    # concatenated (tap-merged) matrices
    t1cat = np.concatenate([t1[0], t1[1], t1[2]], axis=1)       # (WCin,  3*WuCout)
    t2cat = np.concatenate([t2[0], t2[1], t2[2]], axis=1)       # (WuCout,3*WuCout)
    m2cat = np.concatenate([m2[0], m2[1], m2[2]], axis=1)       # (NHu,   3*NHu)
    m1res = np.zeros((2 * NHu, 4 * NH), np.float32)             # [m1cat 0 ; 0 mres]
    m1res[:NHu, 0:NH] = m1[0]
    m1res[:NHu, NH:2 * NH] = m1[1]
    m1res[:NHu, 2 * NH:3 * NH] = m1[2]
    m1res[NHu:, 3 * NH:4 * NH] = mres

    # per-channel <-> lane-dense row scatter/gather (0/1 matrices)
    ecin_s = np.zeros((Cin, WCin), np.float32)
    ecout_s = np.zeros((Cout, WuCout), np.float32)
    for w in range(W):
        for c in range(Cin):
            ecin_s[c, w * Cin + c] = 1.0
    for w in range(Wu):
        for c in range(Cout):
            ecout_s[c, w * Cout + c] = 1.0

    # all four CBN gain/bias projections in one weight (A, 2Cin+2Cout)
    w_aff = np.concatenate([np.asarray(p["wg1"], np.float32),
                            np.asarray(p["wb1"], np.float32),
                            np.asarray(p["wg2"], np.float32),
                            np.asarray(p["wb2"], np.float32)], axis=1)

    # conv1 bias dropped (cancelled by CBN2's mean subtraction); only b2 + b0 remain.
    boutrow = np.tile(np.asarray(p["b2"], np.float32) +
                      np.asarray(p["b0"], np.float32), Wu).reshape(1, WuCout)

    return dict(
        w_aff=jnp.asarray(w_aff),
        ecin_s=jnp.asarray(ecin_s), ecin_g=jnp.asarray(ecin_s.T.copy()),
        ecout_s=jnp.asarray(ecout_s), ecout_g=jnp.asarray(ecout_s.T.copy()),
        t1cat=jnp.asarray(t1cat), t2cat=jnp.asarray(t2cat),
        w0big=jnp.asarray(w0big), m1res=jnp.asarray(m1res), m2cat=jnp.asarray(m2cat),
        boutrow=jnp.asarray(boutrow),
    )


# --------------------------------------------------------------------------- JAX reference
def reference_forward(x, affine, p):
    eps = 1e-4

    def bn_affine(v, gain, bias):
        mean = jnp.mean(v, axis=(0, 1, 2), keepdims=True)
        var = jnp.mean((v - mean) ** 2, axis=(0, 1, 2), keepdims=True)
        vh = (v - mean) / jnp.sqrt(var + eps)
        return vh * gain[:, None, None, :] + bias[:, None, None, :]

    def conv(v, w):
        pad = "SAME" if w.shape[0] == 3 else "VALID"
        return jax.lax.conv_general_dilated(
            v, w, (1, 1), pad, dimension_numbers=("NHWC", "HWIO", "NHWC"))

    up = lambda v: jnp.repeat(jnp.repeat(v, 2, axis=1), 2, axis=2)

    g1 = 1.0 + affine @ p["wg1"]; be1 = affine @ p["wb1"]
    h = jax.nn.relu(bn_affine(x, g1, be1))
    h = up(h)
    y1 = conv(h, p["w1_hwio"]) + p["b1"].reshape(1, 1, 1, -1)
    g2 = 1.0 + affine @ p["wg2"]; be2 = affine @ p["wb2"]
    h2 = jax.nn.relu(bn_affine(y1, g2, be2))
    y2 = conv(h2, p["w2_hwio"]) + p["b2"].reshape(1, 1, 1, -1)
    res = conv(up(x), p["w0_hwio"]) + p["b0"].reshape(1, 1, 1, -1)
    return y2 + res


if __name__ == "__main__":
    N, Cin, Cout, H, A = 2, 4, 8, 16, 32   # x: NHWC (2,16,16,4)  <->  NCHW (2,4,16,16)
    key = jax.random.PRNGKey(0)
    kx, ka, kp = jax.random.split(key, 3)
    x = jax.random.normal(kx, (N, H, H, Cin), jnp.float32)
    affine = jax.random.normal(ka, (N, A), jnp.float32)

    params = init_params(kp, Cin, Cout, A)
    kparams = pack_params(params, N, H, H, Cin, Cout)

    out = jax.block_until_ready(genblock_forward(x, affine, kparams))
    ref = jax.block_until_ready(reference_forward(x, affine, params))

    assert out.shape == (N, 2 * H, 2 * H, Cout)
    np.testing.assert_allclose(np.asarray(out), np.asarray(ref), rtol=2e-3, atol=2e-3)
    print("KERNEL_OK")
</pallas_src>

<mosaic_0001>
module attributes {stable_mosaic.version = 11 : i64} {
  func.func @genblock_kernel(%arg0: memref<2x16x64xf32, #tpu.memory_space<vmem>>, %arg1: memref<2x32xf32, #tpu.memory_space<vmem>>, %arg2: memref<32x24xf32, #tpu.memory_space<vmem>>, %arg3: memref<4x64xf32, #tpu.memory_space<vmem>>, %arg4: memref<64x4xf32, #tpu.memory_space<vmem>>, %arg5: memref<8x256xf32, #tpu.memory_space<vmem>>, %arg6: memref<256x8xf32, #tpu.memory_space<vmem>>, %arg7: memref<64x768xf32, #tpu.memory_space<vmem>>, %arg8: memref<64x256xf32, #tpu.memory_space<vmem>>, %arg9: memref<128x128xf32, #tpu.memory_space<vmem>>, %arg10: memref<256x768xf32, #tpu.memory_space<vmem>>, %arg11: memref<64x192xf32, #tpu.memory_space<vmem>>, %arg12: memref<1x256xf32, #tpu.memory_space<vmem>>, %arg13: memref<64x256xf32, #tpu.memory_space<vmem>>) attributes {dimension_semantics = [], scalar_prefetch = 0 : i64, scratch_operands = 0 : i64, tpu.core_type = #tpu.core_type<tc>} {
    %c0 = arith.constant 0 : index
    %c0_0 = arith.constant 0 : index
    %c0_1 = arith.constant 0 : index
    %0 = vector.load %arg0[%c0, %c0_0, %c0_1] : memref<2x16x64xf32, #tpu.memory_space<vmem>>, vector<2x16x64xf32>
    %1 = vector.shape_cast %0 : vector<2x16x64xf32> to vector<32x64xf32>
    %c0_2 = arith.constant 0 : index
    %c0_3 = arith.constant 0 : index
    %2 = vector.load %arg1[%c0_2, %c0_3] : memref<2x32xf32, #tpu.memory_space<vmem>>, vector<2x32xf32>
    %c0_4 = arith.constant 0 : index
    %c0_5 = arith.constant 0 : index
    %3 = vector.load %arg2[%c0_4, %c0_5] : memref<32x24xf32, #tpu.memory_space<vmem>>, vector<32x24xf32>
    %cst = arith.constant dense<0.000000e+00> : vector<2x24xf32>
    %4 = tpu.matmul %2, %3, %cst {dimension_numbers = #tpu.dot_dimension_numbers<[1], [0], [0], [1], [0, 0, 1, 1], [], []>} : vector<2x32xf32>, vector<32x24xf32>, vector<2x24xf32> -> vector<2x24xf32>
    %5 = vector.extract_strided_slice %4 {offsets = [0, 0], sizes = [2, 4], strides = [1, 1]} : vector<2x24xf32> to vector<2x4xf32>
    %cst_6 = arith.constant 1.000000e+00 : f32
    %6 = vector.broadcast %cst_6 : f32 to vector<2x4xf32>
    %7 = arith.addf %6, %5 : vector<2x4xf32>
    %8 = vector.extract_strided_slice %4 {offsets = [0, 4], sizes = [2, 4], strides = [1, 1]} : vector<2x24xf32> to vector<2x4xf32>
    %9 = vector.extract_strided_slice %4 {offsets = [0, 8], sizes = [2, 8], strides = [1, 1]} : vector<2x24xf32> to vector<2x8xf32>
    %cst_7 = arith.constant 1.000000e+00 : f32
    %10 = vector.broadcast %cst_7 : f32 to vector<2x8xf32>
    %11 = arith.addf %10, %9 : vector<2x8xf32>
    %12 = vector.extract_strided_slice %4 {offsets = [0, 16], sizes = [2, 8], strides = [1, 1]} : vector<2x24xf32> to vector<2x8xf32>
    %cst_8 = arith.constant dense<0.000000e+00> : vector<64xf32>
    %13 = vector.multi_reduction <add>, %1, %cst_8 [0] : vector<32x64xf32> to vector<64xf32>
    %14 = vector.shape_cast %13 : vector<64xf32> to vector<1x64xf32>
    %15 = arith.mulf %1, %1 : vector<32x64xf32>
    %cst_9 = arith.constant dense<0.000000e+00> : vector<64xf32>
    %16 = vector.multi_reduction <add>, %15, %cst_9 [0] : vector<32x64xf32> to vector<64xf32>
    %17 = vector.shape_cast %16 : vector<64xf32> to vector<1x64xf32>
    %18 = tpu.concatenate %14, %17 in 0 : vector<1x64xf32>, vector<1x64xf32> -> vector<2x64xf32>
    %c0_10 = arith.constant 0 : index
    %c0_11 = arith.constant 0 : index
    %19 = vector.load %arg4[%c0_10, %c0_11] : memref<64x4xf32, #tpu.memory_space<vmem>>, vector<64x4xf32>
    %cst_12 = arith.constant dense<0.000000e+00> : vector<2x4xf32>
    %20 = tpu.matmul %18, %19, %cst_12 {dimension_numbers = #tpu.dot_dimension_numbers<[1], [0], [0], [1], [0, 0, 1, 1], [], []>} : vector<2x64xf32>, vector<64x4xf32>, vector<2x4xf32> -> vector<2x4xf32>
    %cst_13 = arith.constant 5.120000e+02 : f32
    %21 = vector.broadcast %cst_13 : f32 to vector<2x4xf32>
    %22 = arith.divf %20, %21 : vector<2x4xf32>
    %23 = vector.extract_strided_slice %22 {offsets = [0, 0], sizes = [1, 4], strides = [1, 1]} : vector<2x4xf32> to vector<1x4xf32>
    %24 = vector.extract_strided_slice %22 {offsets = [1, 0], sizes = [1, 4], strides = [1, 1]} : vector<2x4xf32> to vector<1x4xf32>
    %25 = arith.mulf %23, %23 : vector<1x4xf32>
    %26 = arith.subf %24, %25 : vector<1x4xf32>
    %cst_14 = arith.constant 9.99999974E-5 : f32
    %27 = vector.broadcast %cst_14 : f32 to vector<1x4xf32>
    %28 = arith.addf %26, %27 : vector<1x4xf32>
    %29 = math.rsqrt %28 : vector<1x4xf32>
    %30 = vector.broadcast %29 : vector<1x4xf32> to vector<2x4xf32>
    %31 = arith.mulf %7, %30 : vector<2x4xf32>
    %32 = vector.broadcast %23 : vector<1x4xf32> to vector<2x4xf32>
    %33 = arith.mulf %32, %31 : vector<2x4xf32>
    %34 = arith.subf %8, %33 : vector<2x4xf32>
    %35 = tpu.concatenate %31, %34 in 0 : vector<2x4xf32>, vector<2x4xf32> -> vector<4x4xf32>
    %c0_15 = arith.constant 0 : index
    %c0_16 = arith.constant 0 : index
    %36 = vector.load %arg3[%c0_15, %c0_16] : memref<4x64xf32, #tpu.memory_space<vmem>>, vector<4x64xf32>
    %cst_17 = arith.constant dense<0.000000e+00> : vector<4x64xf32>
    %37 = tpu.matmul %35, %36, %cst_17 {dimension_numbers = #tpu.dot_dimension_numbers<[1], [0], [0], [1], [0, 0, 1, 1], [], []>} : vector<4x4xf32>, vector<4x64xf32>, vector<4x64xf32> -> vector<4x64xf32>
    %38 = vector.extract_strided_slice %37 {offsets = [0, 0], sizes = [2, 64], strides = [1, 1]} : vector<4x64xf32> to vector<2x64xf32>
    %39 = vector.extract_strided_slice %37 {offsets = [2, 0], sizes = [2, 64], strides = [1, 1]} : vector<4x64xf32> to vector<2x64xf32>
    %40 = vector.shape_cast %38 : vector<2x64xf32> to vector<2x1x64xf32>
    %41 = vector.broadcast %40 : vector<2x1x64xf32> to vector<2x16x64xf32>
    %42 = arith.mulf %0, %41 : vector<2x16x64xf32>
    %43 = vector.shape_cast %39 : vector<2x64xf32> to vector<2x1x64xf32>
    %44 = vector.broadcast %43 : vector<2x1x64xf32> to vector<2x16x64xf32>
    %45 = arith.addf %42, %44 : vector<2x16x64xf32>
    %cst_18 = arith.constant 0.000000e+00 : f32
    %46 = vector.broadcast %cst_18 : f32 to vector<2x16x64xf32>
    %47 = arith.maximumf %45, %46 : vector<2x16x64xf32>
    %48 = vector.shape_cast %47 : vector<2x16x64xf32> to vector<32x64xf32>
    %c0_19 = arith.constant 0 : index
    %c0_20 = arith.constant 0 : index
    %49 = vector.load %arg7[%c0_19, %c0_20] : memref<64x768xf32, #tpu.memory_space<vmem>>, vector<64x768xf32>
    %cst_21 = arith.constant dense<0.000000e+00> : vector<32x768xf32>
    %50 = tpu.matmul %48, %49, %cst_21 {dimension_numbers = #tpu.dot_dimension_numbers<[1], [0], [0], [1], [0, 0, 1, 1], [], []>} : vector<32x64xf32>, vector<64x768xf32>, vector<32x768xf32> -> vector<32x768xf32>
    %c0_22 = arith.constant 0 : index
    %c0_23 = arith.constant 0 : index
    %51 = vector.load %arg8[%c0_22, %c0_23] : memref<64x256xf32, #tpu.memory_space<vmem>>, vector<64x256xf32>
    %cst_24 = arith.constant dense<0.000000e+00> : vector<32x256xf32>
    %52 = tpu.matmul %1, %51, %cst_24 {dimension_numbers = #tpu.dot_dimension_numbers<[1], [0], [0], [1], [0, 0, 1, 1], [], []>} : vector<32x64xf32>, vector<64x256xf32>, vector<32x256xf32> -> vector<32x256xf32>
    %53 = vector.extract_strided_slice %50 {offsets = [0, 0], sizes = [32, 256], strides = [1, 1]} : vector<32x768xf32> to vector<32x256xf32>
    %54 = vector.extract_strided_slice %50 {offsets = [0, 256], sizes = [32, 256], strides = [1, 1]} : vector<32x768xf32> to vector<32x256xf32>
    %55 = vector.extract_strided_slice %50 {offsets = [0, 512], sizes = [32, 256], strides = [1, 1]} : vector<32x768xf32> to vector<32x256xf32>
    %56 = tpu.concatenate %53, %54, %55, %52 in 0 : vector<32x256xf32>, vector<32x256xf32>, vector<32x256xf32>, vector<32x256xf32> -> vector<128x256xf32>
    %c0_25 = arith.constant 0 : index
    %c0_26 = arith.constant 0 : index
    %57 = vector.load %arg9[%c0_25, %c0_26] : memref<128x128xf32, #tpu.memory_space<vmem>>, vector<128x128xf32>
    %cst_27 = arith.constant dense<0.000000e+00> : vector<128x256xf32>
    %58 = tpu.matmul %57, %56, %cst_27 {dimension_numbers = #tpu.dot_dimension_numbers<[1], [0], [0], [1], [0, 0, 1, 1], [], []>} : vector<128x128xf32>, vector<128x256xf32>, vector<128x256xf32> -> vector<128x256xf32>
    %59 = vector.extract_strided_slice %58 {offsets = [0, 0], sizes = [64, 256], strides = [1, 1]} : vector<128x256xf32> to vector<64x256xf32>
    %60 = vector.extract_strided_slice %58 {offsets = [64, 0], sizes = [64, 256], strides = [1, 1]} : vector<128x256xf32> to vector<64x256xf32>
    %cst_28 = arith.constant dense<0.000000e+00> : vector<256xf32>
    %61 = vector.multi_reduction <add>, %59, %cst_28 [0] : vector<64x256xf32> to vector<256xf32>
    %62 = vector.shape_cast %61 : vector<256xf32> to vector<1x256xf32>
    %63 = arith.mulf %59, %59 : vector<64x256xf32>
    %cst_29 = arith.constant dense<0.000000e+00> : vector<256xf32>
    %64 = vector.multi_reduction <add>, %63, %cst_29 [0] : vector<64x256xf32> to vector<256xf32>
    %65 = vector.shape_cast %64 : vector<256xf32> to vector<1x256xf32>
    %66 = tpu.concatenate %62, %65 in 0 : vector<1x256xf32>, vector<1x256xf32> -> vector<2x256xf32>
    %c0_30 = arith.constant 0 : index
    %c0_31 = arith.constant 0 : index
    %67 = vector.load %arg6[%c0_30, %c0_31] : memref<256x8xf32, #tpu.memory_space<vmem>>, vector<256x8xf32>
    %cst_32 = arith.constant dense<0.000000e+00> : vector<2x8xf32>
    %68 = tpu.matmul %66, %67, %cst_32 {dimension_numbers = #tpu.dot_dimension_numbers<[1], [0], [0], [1], [0, 0, 1, 1], [], []>} : vector<2x256xf32>, vector<256x8xf32>, vector<2x8xf32> -> vector<2x8xf32>
    %cst_33 = arith.constant 2.048000e+03 : f32
    %69 = vector.broadcast %cst_33 : f32 to vector<2x8xf32>
    %70 = arith.divf %68, %69 : vector<2x8xf32>
    %71 = vector.extract_strided_slice %70 {offsets = [0, 0], sizes = [1, 8], strides = [1, 1]} : vector<2x8xf32> to vector<1x8xf32>
    %72 = vector.extract_strided_slice %70 {offsets = [1, 0], sizes = [1, 8], strides = [1, 1]} : vector<2x8xf32> to vector<1x8xf32>
    %73 = arith.mulf %71, %71 : vector<1x8xf32>
    %74 = arith.subf %72, %73 : vector<1x8xf32>
    %cst_34 = arith.constant 9.99999974E-5 : f32
    %75 = vector.broadcast %cst_34 : f32 to vector<1x8xf32>
    %76 = arith.addf %74, %75 : vector<1x8xf32>
    %77 = math.rsqrt %76 : vector<1x8xf32>
    %78 = vector.broadcast %77 : vector<1x8xf32> to vector<2x8xf32>
    %79 = arith.mulf %11, %78 : vector<2x8xf32>
    %80 = vector.broadcast %71 : vector<1x8xf32> to vector<2x8xf32>
    %81 = arith.mulf %80, %79 : vector<2x8xf32>
    %82 = arith.subf %12, %81 : vector<2x8xf32>
    %83 = tpu.concatenate %79, %82 in 0 : vector<2x8xf32>, vector<2x8xf32> -> vector<4x8xf32>
    %c0_35 = arith.constant 0 : index
    %c0_36 = arith.constant 0 : index
    %84 = vector.load %arg5[%c0_35, %c0_36] : memref<8x256xf32, #tpu.memory_space<vmem>>, vector<8x256xf32>
    %cst_37 = arith.constant dense<0.000000e+00> : vector<4x256xf32>
    %85 = tpu.matmul %83, %84, %cst_37 {dimension_numbers = #tpu.dot_dimension_numbers<[1], [0], [0], [1], [0, 0, 1, 1], [], []>} : vector<4x8xf32>, vector<8x256xf32>, vector<4x256xf32> -> vector<4x256xf32>
    %86 = vector.extract_strided_slice %85 {offsets = [0, 0], sizes = [2, 256], strides = [1, 1]} : vector<4x256xf32> to vector<2x256xf32>
    %87 = vector.extract_strided_slice %85 {offsets = [2, 0], sizes = [2, 256], strides = [1, 1]} : vector<4x256xf32> to vector<2x256xf32>
    %88 = vector.shape_cast %59 : vector<64x256xf32> to vector<2x32x256xf32>
    %89 = vector.shape_cast %86 : vector<2x256xf32> to vector<2x1x256xf32>
    %90 = vector.broadcast %89 : vector<2x1x256xf32> to vector<2x32x256xf32>
    %91 = arith.mulf %88, %90 : vector<2x32x256xf32>
    %92 = vector.shape_cast %87 : vector<2x256xf32> to vector<2x1x256xf32>
    %93 = vector.broadcast %92 : vector<2x1x256xf32> to vector<2x32x256xf32>
    %94 = arith.addf %91, %93 : vector<2x32x256xf32>
    %cst_38 = arith.constant 0.000000e+00 : f32
    %95 = vector.broadcast %cst_38 : f32 to vector<2x32x256xf32>
    %96 = arith.maximumf %94, %95 : vector<2x32x256xf32>
    %97 = vector.shape_cast %96 : vector<2x32x256xf32> to vector<64x256xf32>
    %c0_39 = arith.constant 0 : index
    %c0_40 = arith.constant 0 : index
    %98 = vector.load %arg10[%c0_39, %c0_40] : memref<256x768xf32, #tpu.memory_space<vmem>>, vector<256x768xf32>
    %cst_41 = arith.constant dense<0.000000e+00> : vector<64x768xf32>
    %99 = tpu.matmul %97, %98, %cst_41 {dimension_numbers = #tpu.dot_dimension_numbers<[1], [0], [0], [1], [0, 0, 1, 1], [], []>} : vector<64x256xf32>, vector<256x768xf32>, vector<64x768xf32> -> vector<64x768xf32>
    %100 = vector.extract_strided_slice %99 {offsets = [0, 0], sizes = [64, 256], strides = [1, 1]} : vector<64x768xf32> to vector<64x256xf32>
    %101 = vector.extract_strided_slice %99 {offsets = [0, 256], sizes = [64, 256], strides = [1, 1]} : vector<64x768xf32> to vector<64x256xf32>
    %102 = vector.extract_strided_slice %99 {offsets = [0, 512], sizes = [64, 256], strides = [1, 1]} : vector<64x768xf32> to vector<64x256xf32>
    %103 = tpu.concatenate %100, %101, %102 in 0 : vector<64x256xf32>, vector<64x256xf32>, vector<64x256xf32> -> vector<192x256xf32>
    %c0_42 = arith.constant 0 : index
    %c0_43 = arith.constant 0 : index
    %104 = vector.load %arg11[%c0_42, %c0_43] : memref<64x192xf32, #tpu.memory_space<vmem>>, vector<64x192xf32>
    %cst_44 = arith.constant dense<0.000000e+00> : vector<64x256xf32>
    %105 = tpu.matmul %104, %103, %cst_44 {dimension_numbers = #tpu.dot_dimension_numbers<[1], [0], [0], [1], [0, 0, 1, 1], [], []>} : vector<64x192xf32>, vector<192x256xf32>, vector<64x256xf32> -> vector<64x256xf32>
    %106 = arith.addf %105, %60 : vector<64x256xf32>
    %c0_45 = arith.constant 0 : index
    %c0_46 = arith.constant 0 : index
    %107 = vector.load %arg12[%c0_45, %c0_46] : memref<1x256xf32, #tpu.memory_space<vmem>>, vector<1x256xf32>
    %108 = vector.broadcast %107 : vector<1x256xf32> to vector<64x256xf32>
    %109 = arith.addf %106, %108 : vector<64x256xf32>
    %c0_47 = arith.constant 0 : index
    %c0_48 = arith.constant 0 : index
    %110 = vector.load %arg13[%c0_47, %c0_48] : memref<64x256xf32, #tpu.memory_space<vmem>>, vector<64x256xf32>
    tpu.vector_store %arg13[%c0_47, %c0_48], %109 {strides = array<i32>} : memref<64x256xf32, #tpu.memory_space<vmem>>, vector<64x256xf32>,
    return
  }
}

</mosaic_0001>

<bundles_post_ra>
// kernel: tpu_custom_call.1
= control target key start
LH: loop header
LB: loop body
LE: loop exit
PB: predicated region body
PF: predicated region fallthrough
CT: control target
= control target key end

     0   :  { %18 = vsyncpa [#allocation3], 0  ;;  %s3828_s0 = inlined_call_operand.vmem [shape: f32[2,16,64], index: 0, kind: input, shape index: {}]   ;;  %s3829_s1 = inlined_call_operand.vmem [shape: f32[2,32], index: 1, kind: input, shape index: {}]   ;;  %s3830_s2 = inlined_call_operand.vmem [shape: f32[32,24], index: 2, kind: input, shape index: {}]   ;;  %s3831_s3 = inlined_call_operand.vmem [shape: f32[4,64], index: 3, kind: input, shape index: {}]   ;;  %s3832_s4 = inlined_call_operand.vmem [shape: f32[64,4], index: 4, kind: input, shape index: {}]   ;;  %s3833_s5 = inlined_call_operand.hbm [shape: f32[8,256], index: 5, kind: input, shape index: {}]   ;;  %s3834_s6 = inlined_call_operand.vmem [shape: f32[256,8], index: 6, kind: input, shape index: {}]   ;;  %s3835_s7 = inlined_call_operand.vmem [shape: f32[64,768], index: 7, kind: input, shape index: {}]   ;;  %s3836_s8 = inlined_call_operand.hbm [shape: f32[64,256], index: 8, kind: input, shape index: {}]   ;;  %s3837_s9 = inlined_call_operand.hbm [shape: f32[128,128], index: 9, kind: input, shape index: {}]   ;;  %s3838_s10 = inlined_call_operand.hbm [shape: f32[256,768], index: 10, kind: input, shape index: {}]   ;;  %s3839_s11 = inlined_call_operand.hbm [shape: f32[64,192], index: 11, kind: input, shape index: {}]   ;;  %s3840_s12 = inlined_call_operand.vmem [shape: f32[1,256], index: 12, kind: input, shape index: {}]   ;;  %s3841_s13 = inlined_call_operand.hbm [shape: f32[64,256], index: 13, kind: output, shape index: {}]  }
   0x1   :  { %19 = vsyncpa [#allocation6], 0 }
   0x2   :  { %20 = vsyncpa [#allocation9], 0 }
   0x3   :  { %21 = vsyncpa [#allocation4], 0  ;;  %s2928_s25 = smov [#allocation5]   ;;  %s2788_s29 = scalar_lea.hbm %s3836_s8, 2048 }
   0x4   :  { %s51_s26 = sshll.u32 %s2928_s25, 4  ;;  %p2789_p0 = scmp.ne.s32.totalorder %s3836_s8, %s2788_s29  ;;  %s52_s26 = int_to_ptr.vmem [resolvable:$true] %s51_s26 }
   0x5   :  { %p2792_p1 = scmp.lt.u32.totalorder %s2788_s29, %s3836_s8 }
   0x7   :  { %p2794_p2 = pnand %p2792_p1, %p2789_p0 }
   0x9   :  { %2797 = shalt.err (!%p2794_p2)
}
   0xa   :  { %s2798_s17 = scalar_lea.vmem %s52_s26, 2048  ;;  %p2803_p4 = scmp.lt.s32.totalorder %s52_s26, %s52_s26 }
   0xb   :  { %p2799_p3 = scmp.ne.s32.totalorder %s52_s26, %s2798_s17  ;;  %p2804_p5 = scmp.lt.s32.totalorder %s2798_s17, %s2798_s17 }
   0xd   :  { %p2805_p6 = por %p2804_p5, %p2803_p4 }
   0xf   :  { %p2806_p7 = pnand %p2805_p6, %p2799_p3 }
  0x11   :  { %2809 = shalt.err (!%p2806_p7)
}
  0x12   :  { %s2929_s18 = smov 256   ;;  %s2930_s19 = smov 16  }
  0x13   :  { %57 = dma.hbm_to_vmem [thread:$0]  %s3836_s8, 2048, %s52_s26, [#allocation6], %s2929_s18, %s2929_s18, %s2930_s19  }
  0x14   :  { %s2931_s22 = smov [#allocation8]   ;;  %s2810_s27 = scalar_lea.hbm %s3838_s10, 24576 }
  0x15   :  { %s75_s23 = sshll.u32 %s2931_s22, 4  ;;  %p2811_p8 = scmp.ne.s32.totalorder %s3838_s10, %s2810_s27  ;;  %s76_s23 = int_to_ptr.vmem [resolvable:$true] %s75_s23 }
  0x16   :  { %p2814_p9 = scmp.lt.u32.totalorder %s2810_s27, %s3838_s10 }
  0x18   :  { %p2816_p10 = pnand %p2814_p9, %p2811_p8 }
  0x1a   :  { %2819 = shalt.err (!%p2816_p10)
}
  0x1b   :  { %s2820_s15 = scalar_lea.vmem %s76_s23, 24576  ;;  %p2825_p12 = scmp.lt.s32.totalorder %s76_s23, %s76_s23 }
  0x1c   :  { %p2821_p11 = scmp.ne.s32.totalorder %s76_s23, %s2820_s15  ;;  %p2826_p13 = scmp.lt.s32.totalorder %s2820_s15, %s2820_s15 }
  0x1e   :  { %p2827_p0 = por %p2826_p13, %p2825_p12 }
  0x20   :  { %p2828_p1 = pnand %p2827_p0, %p2821_p11 }
  0x22   :  { %2831 = shalt.err (!%p2828_p1)
}
  0x23   :  { %s2932_s8 = smov 768   ;;  %s2933_s26 = smov 48  }
  0x24   :  { %81 = dma.hbm_to_vmem [thread:$0]  %s3838_s10, 24576, %s76_s23, [#allocation9], %s2932_s8, %s2932_s8, %s2933_s26  }
  0x25   :  { %s2934_s20 = smov [#allocation2]   ;;  %s2935_s22 = smov [#allocation7]  }
  0x26   :  { %s38_s21 = sshll.u32 %s2934_s20, 4  ;;  %s63_s24 = sshll.u32 %s2935_s22, 4  ;;  %s39_s21 = int_to_ptr.vmem [resolvable:$true] %s38_s21  ;;  %s3044_s24 = int_to_ptr.vmem [resolvable:$true] %s63_s24 }
  0x27   :  { %s2832_s28 = scalar_lea.hbm %s3833_s5, 256 }
  0x28   :  { %p2833_p2 = scmp.ne.s32.totalorder %s3833_s5, %s2832_s28  ;;  %p2836_p3 = scmp.lt.u32.totalorder %s2832_s28, %s3833_s5 }
  0x2a   :  { %p2838_p4 = pnand %p2836_p3, %p2833_p2 }
  0x2c   :  { %2841 = shalt.err (!%p2838_p4)
}
  0x2d   :  { %s2842_s10 = scalar_lea.vmem %s39_s21, 256  ;;  %p2847_p6 = scmp.lt.s32.totalorder %s39_s21, %s39_s21 }
  0x2e   :  { %p2843_p5 = scmp.ne.s32.totalorder %s39_s21, %s2842_s10  ;;  %p2848_p7 = scmp.lt.s32.totalorder %s2842_s10, %s2842_s10 }
  0x30   :  { %p2849_p8 = por %p2848_p7, %p2847_p6 }
  0x32   :  { %p2850_p9 = pnand %p2849_p8, %p2843_p5 }
  0x34   :  { %2853 = shalt.err (!%p2850_p9)
}
  0x35   :  { %41 = dma.hbm_to_vmem [thread:$0]  %s3833_s5, 256, %s39_s21, [#allocation3]  }
  0x36   :  { %s2854_s17 = scalar_lea.hbm %s3837_s9, 2048 }
  0x37   :  { %p2855_p10 = scmp.ne.s32.totalorder %s3837_s9, %s2854_s17  ;;  %p2858_p11 = scmp.lt.u32.totalorder %s2854_s17, %s3837_s9 }
  0x39   :  { %p2860_p12 = pnand %p2858_p11, %p2855_p10 }
  0x3b   :  { %2863 = shalt.err (!%p2860_p12)
}
  0x3c   :  { %s2864_s28 = scalar_lea.vmem %s3044_s24, 2048  ;;  %p2869_p0 = scmp.lt.s32.totalorder %s3044_s24, %s3044_s24 }
  0x3d   :  { %p2865_p13 = scmp.ne.s32.totalorder %s3044_s24, %s2864_s28  ;;  %p2870_p1 = scmp.lt.s32.totalorder %s2864_s28, %s2864_s28 }
  0x3f   :  { %p2871_p2 = por %p2870_p1, %p2869_p0 }
  0x41   :  { %p2872_p3 = pnand %p2871_p2, %p2865_p13 }
  0x43   :  { %2875 = shalt.err (!%p2872_p3)
}
  0x44   :  { %s2936_s5 = smov 128   ;;  %s2937_s21 = smov 8  }
  0x45   :  { %69 = dma.hbm_to_vmem [thread:$0]  %s3837_s9, 2048, %s3044_s24, [#allocation6], %s2936_s5, %s2936_s5, %s2937_s21  }
  0x46   :  { %s2938_s14 = smov [#allocation10]   ;;  %s2876_s8 = scalar_lea.hbm %s3839_s11, 2048 }
  0x47   :  { %s87_s15 = sshll.u32 %s2938_s14, 4  ;;  %p2877_p4 = scmp.ne.s32.totalorder %s3839_s11, %s2876_s8  ;;  %s88_s15 = int_to_ptr.vmem [resolvable:$true] %s87_s15 }
  0x48   :  { %p2880_p5 = scmp.lt.u32.totalorder %s2876_s8, %s3839_s11 }
  0x4a   :  { %p2882_p6 = pnand %p2880_p5, %p2877_p4 }
  0x4c   :  { %2885 = shalt.err (!%p2882_p6)
}
  0x4d   :  { %s2886_s22 = scalar_lea.vmem %s88_s15, 2048  ;;  %p2891_p8 = scmp.lt.s32.totalorder %s88_s15, %s88_s15 }
  0x4e   :  { %p2887_p7 = scmp.ne.s32.totalorder %s88_s15, %s2886_s22  ;;  %p2892_p9 = scmp.lt.s32.totalorder %s2886_s22, %s2886_s22 }
  0x50   :  { %p2893_p10 = por %p2892_p9, %p2891_p8 }
  0x52   :  { %p2894_p11 = pnand %p2893_p10, %p2887_p7 }
  0x54   :  { %2897 = shalt.err (!%p2894_p11)
}
  0x55   :  { %93 = dma.hbm_to_vmem [thread:$0]  %s3839_s11, 2048, %s88_s15, [#allocation9], %s2929_s18, %s2929_s18, %s2930_s19  }
  0x56   :  { %2920 = dma.done.wait [#allocation3], 256  }
  0x57   :  { %2921 = vsyncadd [#allocation3], 4294967040 }
  0x58   :  { %2922 = dma.done.wait [#allocation6], 4096  }
  0x59   :  { %2923 = vsyncadd [#allocation6], 4294963200 }
  0x5a   :  { %2924 = dma.done.wait [#allocation9], 26624  }
  0x5b   :  { %2925 = vsyncadd [#allocation9], 4294940672  ;;  %v2939_v0 = vmov 0.0|0.0   ;;  %vm2940_vm0 = vmmov 0   ;;  %v2941_v1 = vmov 0.0   ;;  %v228_v2 = vld [vmem:[%s3832_s4] sm:$0xff] }
  0x5c   :  { %2369 = vmatprep.subr.bf16.mxu1 %v2939_v0  ;;  %2355 = vmatprep.mubr.msk.f32.mxu1 %vm2940_vm0, %v2941_v1  ;;  %v229_v3 = vld [vmem:[%s3832_s4 + $0x8] sm:$0xff]  ;;  %v230_v4 = vld [vmem:[%s3832_s4 + $0x10] sm:$0xff]  ;;  %vm195_vm1 = vcmask 523264   ;;  %v231_v6 = vld [vmem:[%s3832_s4 + $0x18] sm:$0xff]  ;;  %vm120_vm2 = vcmask 261120   ;;  %vm226_vm3 = vcmask 1040384  }
  0x5d   :  { %2363 = vmatprep.subr.bf16.mxu0 %v2939_v0  ;;  %2336 = vmatprep.mubr.msk.f32.mxu0 %vm2940_vm0, %v2941_v1  ;;  %v2370_v5 = vpack.c.bf16 %v229_v3, %v228_v2  ;;  %v232_v7 = vld [vmem:[%s3832_s4 + $0x20] sm:$0xff]  ;;  %v2373_v9 = vpack.c.bf16 %v231_v6, %v230_v4  ;;  %v3118_v10 = vld [vmem:[%s3828_s0 + $0x8] sm:$0xff]  ;;  %v3123_v11 = vld [vmem:[%s3828_s0 + $0x10] sm:$0xff]  ;;  %v318_v2 = vlaneseq  ;;  %vm345_vm4 = vcmask 1043456   ;;  %s2942_s16 = smov 4   ;;  %s2943_s29 = smov 124  }
  0x5e   :  { %v3113_v8 = vld [vmem:[%s3828_s0] sm:$0xff]  ;;  %v3128_v12 = vld [vmem:[%s3828_s0 + $0x18] sm:$0xff]  ;;  %v233_v15 = vld [vmem:[%s3832_s4 + $0x28] sm:$0xff]  ;;  %v197_v16 = vsel %vm195_vm1, %v3118_v10, 0.0  ;;  %v199_v17 = vsel %vm195_vm1, %v3123_v11, 0.0  ;;  %v210_v18 = vmul.f32 %v3118_v10, %v3118_v10  ;;  %v211_v22 = vmul.f32 %v3123_v11, %v3123_v11 }
  0x5f   :  { %2371 = vmatpush3.bf16.msra.mxu1 %v2370_v5  ;;  %v196_v13 = vsel %vm195_vm1, %v3113_v8, 0.0  ;;  %v209_v14 = vmul.f32 %v3113_v8, %v3113_v8  ;;  %v116_v19 = vld [vmem:[%s3830_s2] sm:$0xff]  ;;  %v117_v20 = vld [vmem:[%s3830_s2 + $0x8] sm:$0xff]  ;;  %v212_v23 = vmul.f32 %v3128_v12, %v3128_v12  ;;  %v118_v25 = vld [vmem:[%s3830_s2 + $0x10] sm:$0xff]  ;;  %v201_v27 = vsel %vm195_vm1, %v3128_v12, 0.0 }
  0x60   :  { %2372 = vmatprep.subr.bf16.mxu1 %v2939_v0  ;;  %v198_v21 = vadd.f32 %v197_v16, %v196_v13  ;;  %v119_v26 = vld [vmem:[%s3830_s2 + $0x18] sm:$0xff]  ;;  %v214_v28 = vsel %vm195_vm1, %v210_v18, 0.0  ;;  %v2364_v29 = vpack.c.bf16 %v117_v20, %v116_v19  ;;  %v2376_v30 = vpack.c.bf16 %v233_v15, %v232_v7  ;;  %v234_v34 = vld [vmem:[%s3832_s4 + $0x30] sm:$0xff]  ;;  %v115_v43 = vld [vmem:[%s3829_s1] sm:$0x3] }
  0x61   :  { %v213_v24 = vsel %vm195_vm1, %v209_v14, 0.0  ;;  %v216_v33 = vsel %vm195_vm1, %v211_v22, 0.0  ;;  %v235_v35 = vld [vmem:[%s3832_s4 + $0x38] sm:$0xff]  ;;  %v218_v36 = vsel %vm195_vm1, %v212_v23, 0.0  ;;  %v2367_v37 = vpack.c.bf16 %v119_v26, %v118_v25  ;;  %v340_v5 = vld [vmem:[%s3831_s3] sm:$0xf] }
  0x62   :  { %v200_v31 = vadd.f32 %v199_v17, %v198_v21  ;;  %v215_v32 = vadd.f32 %v214_v28, %v213_v24  ;;  %2365 = vmatpush3.bf16.msra.mxu0 %v2364_v29  ;;  %v2379_v40 = vpack.c.bf16 %v235_v35, %v234_v34  ;;  %v3182_v3 = vshrl.u32 %v318_v2, 7  ;;  %v477_v17 = vld [vmem:[%s3835_s7 + $0x8] sm:$0xff]  ;;  %v483_v18 = vld [vmem:[%s3835_s7 + $0x38] sm:$0xff]  ;;  %v476_v19 = vld [vmem:[%s3835_s7] sm:$0xff] }
  0x63   :  { %2374 = vmatpush3.bf16.msra.mxu1 %v2373_v9  ;;  %2366 = vmatprep.subr.bf16.mxu0 %v2939_v0  ;;  %v2381_v20 = vpack.c.bf16 %v483_v18, %v477_v17  ;;  %v482_v21 = vld [vmem:[%s3835_s7 + $0x30] sm:$0xff]  ;;  %v479_v22 = vld [vmem:[%s3835_s7 + $0x18] sm:$0xff]  ;;  %v485_v23 = vld [vmem:[%s3835_s7 + $0x48] sm:$0xff]  ;;  %vm338_vm5 = vcmask 1041408   ;;  %vm341_vm6 = vcmask 31744   ;;  %vm1312_vm7 = vcmask 64512  }
  0x64   :  { %2375 = vmatprep.subr.bf16.mxu1 %v2939_v0  ;;  %v202_v38 = vadd.f32 %v201_v27, %v200_v31  ;;  %v217_v39 = vadd.f32 %v216_v33, %v215_v32  ;;  %v3185_v4 = vsub.s32 1, %v3182_v3  ;;  %v3194_v7 = vsub.s32 0, %v3182_v3  ;;  %v478_v29 = vld [vmem:[%s3835_s7 + $0x10] sm:$0xff]  ;;  %v489_v34 = vld [vmem:[%s3835_s7 + $0x68] sm:$0xff]  ;;  %v495_v35 = vld [vmem:[%s3835_s7 + $0x98] sm:$0xff] }
  0x65   :  { %v2383_v24 = vpack.c.bf16 %v482_v21, %v476_v19  ;;  %v2397_v25 = vpack.c.bf16 %v485_v23, %v479_v22  ;;  %v521_v2 = vld [vmem:[%s3835_s7 + $0x168] sm:$0xff]  ;;  %v487_v17 = vld [vmem:[%s3835_s7 + $0x58] sm:$0xff]  ;;  %v2944_v22 = vmov 1966171168  }
  0x66   :  { %v203_v41 = vrot.slane %v202_v38, 4  ;;  %v219_v42 = vadd.f32 %v218_v36, %v217_v39  ;;  %2368 = vmatpush3.bf16.msra.mxu0 %v2367_v37  ;;  %v491_v36 = vld [vmem:[%s3835_s7 + $0x78] sm:$0xff]  ;;  %v2385_v37 = vpack.c.bf16 %v495_v35, %v489_v34  ;;  %v494_v39 = vld [vmem:[%s3835_s7 + $0x90] sm:$0xff]  ;;  %v421_v23 = vunpack.c.l.s4 %v2944_v22  ;;  %v480_v35 = vld [vmem:[%s3835_s7 + $0x20] sm:$0xff] }
  0x67   :  { %2377 = vmatpush3.bf16.msra.mxu1 %v2376_v30  ;;  %2382 = vmatprep.subr.bf16.mxu0 %v2381_v20  ;;  %v484_v30 = vld [vmem:[%s3835_s7 + $0x40] sm:$0xff]  ;;  %v804_v19 = vld [vmem:[#allocation5 + $0x8] sm:$0xff]  ;;  %v806_v20 = vld [vmem:[#allocation5 + $0x18] sm:$0xff] }
  0x68   :  { %2378 = vmatprep.subr.bf16.mxu1 %v2939_v0  ;;  %v204_v44 = vadd.f32 %v203_v41, %v202_v38  ;;  %v220_v45 = vrot.slane %v219_v42, 4  ;;  %v2399_v31 = vpack.c.bf16 %v484_v30, %v478_v29  ;;  %v488_v38 = vld [vmem:[%s3835_s7 + $0x60] sm:$0xff]  ;;  %v2429_v21 = vpack.c.bf16 %v806_v20, %v804_v19  ;;  %v811_v20 = vld [vmem:[#allocation5 + $0x40] sm:$0xff] }
  0x69   :  { %2337 = vmatmul.mubr.msk.f32.vlgmr.msra.gmra.mrb[0].mxu0 %vm120_vm2, %v115_v43  ;;  %v2387_v41 = vpack.c.bf16 %v494_v39, %v488_v38  ;;  %v490_v43 = vld [vmem:[%s3835_s7 + $0x70] sm:$0xff] }
  0x6a   :  { %v205_v46 = vrot.slane %v204_v44, 2  ;;  %v221_v47 = vadd.f32 %v220_v45, %v219_v42  ;;  %600 = vmatprep.mubr.f32.mxu0 %v2941_v1  ;;  %2384 = vmatpush1.bf16.msra.mxu0 %v2383_v24  ;;  %v422_v24 = vunpack.c.0.s8 %v421_v23  ;;  %v486_v39 = vld [vmem:[%s3835_s7 + $0x50] sm:$0xff]  ;;  %v516_v23 = vld [vmem:[%s3835_s7 + $0x140] sm:$0xff] }
  0x6b   :  { %2380 = vmatpush3.bf16.msra.mxu1 %v2379_v40  ;;  %v497_v40 = vld [vmem:[%s3835_s7 + $0xa8] sm:$0xff]  ;;  %2386 = vmatprep.subr.bf16.mxu0 %v2385_v37 }
  0x6c   :  { %2358 = vmatprep.subr.mxu1 %v2941_v1  ;;  %v206_v48 = vadd.f32 %v205_v46, %v204_v44  ;;  %v222_v49 = vrot.slane %v221_v47, 2  ;;  %v2401_v42 = vpack.c.bf16 %v497_v40, %v491_v36  ;;  %v496_v44 = vld [vmem:[%s3835_s7 + $0xa0] sm:$0xff]  ;;  %v501_v46 = vld [vmem:[%s3835_s7 + $0xc8] sm:$0xff] }
  0x6d   :  { %v2403_v45 = vpack.c.bf16 %v496_v44, %v490_v43  ;;  %v493_v40 = vld [vmem:[%s3835_s7 + $0x88] sm:$0xff]  ;;  %v803_v43 = vld [vmem:[#allocation5] sm:$0xff]  ;;  %v805_v44 = vld [vmem:[#allocation5 + $0x10] sm:$0xff] }
  0x6e   :  { %v207_v50 = vrot.slane %v206_v48, 1  ;;  %v223_v51 = vadd.f32 %v222_v49, %v221_v47  ;;  %2388 = vmatpush1.bf16.msra.mxu0 %v2387_v41  ;;  %v507_v47 = vld [vmem:[%s3835_s7 + $0xf8] sm:$0xff] }
  0x6f   :  { %v2389_v49 = vpack.c.bf16 %v507_v47, %v501_v46  ;;  %v499_v41 = vld [vmem:[%s3835_s7 + $0xb8] sm:$0xff] }
  0x70   :  { %v208_v52 = vadd.f32 %v207_v50, %v206_v48  ;;  %v224_v53 = vrot.slane %v223_v51, 1  ;;  %v503_v48 = vld [vmem:[%s3835_s7 + $0xd8] sm:$0xff]  ;;  %v500_v50 = vld [vmem:[%s3835_s7 + $0xc0] sm:$0xff]  ;;  %v2417_v46 = vpack.c.bf16 %v499_v41, %v493_v40 }
  0x71   :  { %2390 = vmatprep.subr.bf16.mxu0 %v2389_v49 }
  0x72   :  { %v225_v54 = vadd.f32 %v224_v53, %v223_v51  ;;  %v506_v51 = vld [vmem:[%s3835_s7 + $0xf0] sm:$0xff] }
  0x73   :  { %v2391_v53 = vpack.c.bf16 %v506_v51, %v500_v50  ;;  %v492_v51 = vld [vmem:[%s3835_s7 + $0x80] sm:$0xff] }
  0x74   :  { %v227_v55 = vsel %vm226_vm3, %v208_v52, %v225_v54  ;;  %v509_v52 = vld [vmem:[%s3835_s7 + $0x108] sm:$0xff] }
  0x75   :  { %2356 = vmatmul.mubr.msk.f32.vlgmr.msra.gmra.mrb[0].mxu1 %vm195_vm1, %v227_v55  ;;  %v2405_v54 = vpack.c.bf16 %v509_v52, %v503_v48  ;;  %v502_v55 = vld [vmem:[%s3835_s7 + $0xd0] sm:$0xff]  ;;  %2392 = vmatpush1.bf16.msra.mxu0 %v2391_v53  ;;  %v2431_v53 = vpack.c.bf16 %v805_v44, %v803_v43 }
  0x76   :  { %2360 = vmatprep.mubr.msk.f32.mxu1 %vm2940_vm0, %v2941_v1  ;;  %2359 = vmatpush3.msk.msra.mxu1 %vm345_vm4, %v340_v5  ;;  %v498_v52 = vld [vmem:[%s3835_s7 + $0xb0] sm:$0xff] }
  0x77   :  { %2398 = vmatprep.subr.bf16.mxu1 %v2397_v25  ;;  %v3305_v25 = vsub.s32 %v422_v24, %v3182_v3  ;;  %v522_v24 = vld [vmem:[%s3835_s7 + $0x170] sm:$0xff] }
 0x13c   :  { %v3180_v56 = vpop.f32.mrb[0].mxu0 }
 0x13d   :  { %v2338_v57 = vpop.f32.mrb[1].mxu0  ;;  %v3191_v6 = vadd.f32 1.0, %v3180_v56 }
 0x13e   :  { %v508_v57 = vld [vmem:[%s3835_s7 + $0x100] sm:$0xff] }
 0x148   :  { %v305_v58 = vpop.f32.mrb[0].mxu1 }
 0x149   :  { %v310_v59 = vmul.f32 0.001953125, %v305_v58  ;;  %v2357_v60 = vpop.f32.mrb[1].mxu1  ;;  %v2407_v58 = vpack.c.bf16 %v508_v57, %v502_v55  ;;  %v511_v55 = vld [vmem:[%s3835_s7 + $0x118] sm:$0xff] }
 0x14a   :  { %v519_v60 = vld [vmem:[%s3835_s7 + $0x158] sm:$0xff] }
 0x14b   :  { %v311_v61 = vmul.f32 %v310_v59, %v310_v59  ;;  %v326_v15 = vrot.slane %v310_v59, %v3194_v7  ;;  %v808_v57 = vld [vmem:[#allocation5 + $0x28] sm:$0xff] }
 0x14d   :  { %v313_v62 = vrot.slane %v311_v61, 7  ;;  %v515_v61 = vld [vmem:[%s3835_s7 + $0x138] sm:$0xff] }
 0x14f   :  { %v315_v63 = vsub.f32 %v310_v59, %v313_v62  ;;  %v513_v59 = vld [vmem:[%s3835_s7 + $0x128] sm:$0xff] }
 0x150   :  { %v2393_v62 = vpack.c.bf16 %v519_v60, %v513_v59  ;;  %v2419_v59 = vpack.c.bf16 %v498_v52, %v492_v51  ;;  %v807_v60 = vld [vmem:[#allocation5 + $0x20] sm:$0xff] }
 0x151   :  { %v316_v0 = vadd.f32 0.0001, %v315_v63  ;;  %v512_v63 = vld [vmem:[%s3835_s7 + $0x120] sm:$0xff] }
 0x152   :  { %2394 = vmatprep.subr.bf16.mxu0 %v2393_v62 }
 0x153   :  { %2784 = vrsqrt.f32 %v316_v0  ;;  %v518_v0 = vld [vmem:[%s3835_s7 + $0x150] sm:$0xff] }
 0x154   :  { %v2395_v5 = vpack.c.bf16 %v518_v0, %v512_v63 }
 0x156   :  { %2396 = vmatpush1.bf16.msra.mxu0 %v2395_v5  ;;  %v510_v5 = vld [vmem:[%s3835_s7 + $0x110] sm:$0xff] }
 0x15d   :  { %v2785_v9 = vpop.eup %2784 }
 0x15e   :  { %v321_v13 = vrot.slane %v2785_v9, %v3185_v4  ;;  %v2409_v9 = vpack.c.bf16 %v521_v2, %v515_v61  ;;  %v504_v2 = vld [vmem:[%s3835_s7 + $0xe0] sm:$0xff] }
 0x160   :  { %v322_v14 = vmul.f32 %v321_v13, %v3191_v6  ;;  %v514_v13 = vld [vmem:[%s3835_s7 + $0x130] sm:$0xff] }
 0x162   :  { %v327_v16 = vmul.f32 %v326_v15, %v322_v14 }
 0x164   :  { %329 = vrot.lane.b32.xlu0 %v327_v16, %s2942_s16  ;;  %v481_v16 = vld [vmem:[%s3835_s7 + $0x28] sm:$0xff] }
 0x165   :  { %v2413_v18 = vpack.c.bf16 %v487_v17, %v481_v16  ;;  %v523_v16 = vld [vmem:[%s3835_s7 + $0x178] sm:$0xff]  ;;  %v814_v17 = vld [vmem:[#allocation5 + $0x58] sm:$0xff] }
 0x167   :  { %2414 = vmatprep.subr.bf16.mxu0 %v2413_v18  ;;  %v2423_v18 = vpack.c.bf16 %v510_v5, %v504_v2 }
 0x1d6   :  { %v330_v26 = vpop.permute.xlu0 %329 }
 0x1d7   :  { %v332_v27 = vsub.f32 %v3180_v56, %v330_v26 }
 0x1d9   :  { %v334_v28 = vrot.slane %v332_v27, 6 }
 0x1db   :  { %335 = vrot.lane.b32.xlu0 %v334_v28, %s2943_s29 }
 0x24d   :  { %v336_v32 = vpop.permute.xlu0 %335 }
 0x24e   :  { %v339_v33 = vsel %vm338_vm5, %v322_v14, %v336_v32  ;;  %v520_v14 = vld [vmem:[%s3835_s7 + $0x160] sm:$0xff] }
 0x24f   :  { %2361 = vmatmul.mubr.msk.f32.vlgmr.msra.gmra.mrb[2].mxu1 %vm341_vm6, %v339_v33  ;;  %v2411_v15 = vpack.c.bf16 %v520_v14, %v514_v13  ;;  %v812_v14 = vld [vmem:[#allocation5 + $0x48] sm:$0xff] }
 0x250   :  { %2400 = vmatpush1.bf16.msra.mxu1 %v2399_v31  ;;  %689 = vmatprep.mubr.f32.mxu1 %v2941_v1 }
 0x251   :  { %2402 = vmatprep.subr.bf16.mxu1 %v2401_v42 }
 0x254   :  { %2404 = vmatpush1.bf16.msra.mxu1 %v2403_v45  ;;  %v2415_v45 = vpack.c.bf16 %v486_v39, %v480_v35  ;;  %v815_v35 = vld [vmem:[#allocation5 + $0x60] sm:$0xff] }
 0x255   :  { %2406 = vmatprep.subr.bf16.mxu1 %v2405_v54  ;;  %v505_v54 = vld [vmem:[%s3835_s7 + $0xe8] sm:$0xff] }
 0x256   :  { %v2421_v63 = vpack.c.bf16 %v511_v55, %v505_v54 }
 0x258   :  { %2408 = vmatpush1.bf16.msra.mxu1 %v2407_v58  ;;  %v810_v58 = vld [vmem:[#allocation5 + $0x38] sm:$0xff] }
 0x259   :  { %2410 = vmatprep.subr.bf16.mxu1 %v2409_v9  ;;  %v809_v9 = vld [vmem:[#allocation5 + $0x30] sm:$0xff]  ;;  %v2433_v13 = vpack.c.bf16 %v810_v58, %v808_v57 }
 0x25a   :  { %v2435_v19 = vpack.c.bf16 %v809_v9, %v807_v60 }
 0x25c   :  { %2412 = vmatpush1.bf16.msra.mxu1 %v2411_v15  ;;  %v517_v15 = vld [vmem:[%s3835_s7 + $0x148] sm:$0xff] }
 0x25d   :  { %2430 = vmatprep.subr.bf16.mxu1 %v2429_v21 }
 0x322   :  { %v415_v26 = vpop.f32.mrb[2].mxu1 }
 0x323   :  { %v426_v27 = vrot.slane %v415_v26, %v3305_v25  ;;  %v2362_v28 = vpop.f32.mrb[3].mxu1  ;;  %v813_v26 = vld [vmem:[#allocation5 + $0x50] sm:$0xff] }
 0x324   :  { %v2437_v28 = vpack.c.bf16 %v814_v17, %v812_v14 }
 0x325   :  { %v427_v29 = vcombine.high %v426_v27, %v426_v27  ;;  %v434_v30 = vrot.slane %v426_v27, %v3305_v25  ;;  %v2425_v27 = vpack.c.bf16 %v523_v16, %v517_v15 }
 0x327   :  { %v441_v31 = vrot.slane %v427_v29, %v3305_v25  ;;  %v445_v32 = vrot.slane %v434_v30, %v3194_v7  ;;  %v456_v33 = vcombine.high %v434_v30, %v434_v30  ;;  %v816_v29 = vld [vmem:[#allocation5 + $0x68] sm:$0xff]  ;;  %v818_v30 = vld [vmem:[#allocation5 + $0x78] sm:$0xff] }
 0x329   :  { %v452_v34 = vmul.f32 %v445_v32, %v3113_v8  ;;  %v449_v3 = vrot.slane %v441_v31, %v3194_v7  ;;  %v453_v36 = vmul.f32 %v445_v32, %v3118_v10  ;;  %v457_v37 = vcombine.high %v441_v31, %v441_v31 }
 0x32a   :  { %v461_v38 = vrot.slane %v456_v33, %v3194_v7  ;;  %v2427_v31 = vpack.c.bf16 %v522_v24, %v516_v23  ;;  %v2439_v32 = vpack.c.bf16 %v813_v26, %v811_v20 }
 0x32b   :  { %v454_v47 = vmul.f32 %v449_v3, %v3123_v11  ;;  %v465_v48 = vrot.slane %v457_v37, %v3194_v7  ;;  %v455_v61 = vmul.f32 %v449_v3, %v3128_v12  ;;  %v817_v3 = vld [vmem:[#allocation5 + $0x70] sm:$0xff] }
 0x32c   :  { %v468_v42 = vadd.f32 %v461_v38, %v452_v34  ;;  %v469_v50 = vadd.f32 %v461_v38, %v453_v36  ;;  %v2441_v34 = vpack.c.bf16 %v818_v30, %v816_v29  ;;  %v2443_v36 = vpack.c.bf16 %v817_v3, %v815_v35  ;;  %v921_v29 = vld [vmem:[#allocation7 + $0x8] sm:$0xff]  ;;  %v922_v30 = vld [vmem:[#allocation7 + $0x10] sm:$0xff]  ;;  %v927_v35 = vld [vmem:[#allocation7 + $0x38] sm:$0xff] }
 0x32d   :  { %v470_v0 = vadd.f32 %v465_v48, %v454_v47  ;;  %v471_v22 = vadd.f32 %v465_v48, %v455_v61  ;;  %v1183_v3 = vld [vmem:[%s3834_s6 + $0x80] sm:$0xff] }
 0x32e   :  { %v3329_v49 = vmax.f32 %v468_v42, 0.0  ;;  %v473_v62 = vmax.f32 %v469_v50, 0.0 }
 0x32f   :  { %v474_v21 = vmax.f32 %v470_v0, 0.0  ;;  %v475_v33 = vmax.f32 %v471_v22, 0.0 }
 0x330   :  { %2252 = vmatmul.mubr.msk.f32.vlgmr.msra.gmra.mrb[2].mxu0 %vm195_vm1, %v3329_v49  ;;  %2256 = vmatmul.mubr.msk.f32.vlgmr.msra.gmra.mrb[4].mxu1 %vm195_vm1, %v3329_v49 }
 0x331   :  { %2416 = vmatpush1.bf16.msra.mxu0 %v2415_v45  ;;  %606 = vmatprep.mubr.f32.mxu0 %v2941_v1 }
 0x332   :  { %695 = vmatprep.mubr.f32.mxu1 %v2941_v1  ;;  %2418 = vmatprep.subr.bf16.mxu0 %v2417_v46 }
 0x333   :  { %2432 = vmatpush1.bf16.msra.mxu1 %v2431_v53 }
 0x334   :  { %2253 = vmatmul.mubr.msk.f32.gmra.mrb[4].mxu0 %vm195_vm1, %v473_v62  ;;  %2257 = vmatmul.mubr.msk.f32.gmra.mrb[6].mxu1 %vm195_vm1, %v473_v62 }
 0x335   :  { %2420 = vmatpush1.bf16.msra.mxu0 %v2419_v59  ;;  %612 = vmatprep.mubr.f32.mxu0 %v2941_v1 }
 0x336   :  { %701 = vmatprep.mubr.f32.mxu1 %v2941_v1  ;;  %2422 = vmatprep.subr.bf16.mxu0 %v2421_v63 }
 0x337   :  { %2434 = vmatprep.subr.bf16.mxu1 %v2433_v13 }
 0x338   :  { %2254 = vmatmul.mubr.msk.f32.gmra.mrb[6].mxu0 %vm195_vm1, %v474_v21  ;;  %2258 = vmatmul.mubr.msk.f32.gmra.mrb[8].mxu1 %vm195_vm1, %v474_v21 }
 0x339   :  { %2424 = vmatpush1.bf16.msra.mxu0 %v2423_v18  ;;  %2436 = vmatpush1.bf16.msra.mxu1 %v2435_v19 }
 0x33a   :  { %618 = vmatprep.mubr.f32.mxu0 %v2941_v1  ;;  %707 = vmatprep.mubr.f32.mxu1 %v2941_v1 }
 0x33b   :  { %2426 = vmatprep.subr.bf16.mxu0 %v2425_v27  ;;  %2438 = vmatprep.subr.bf16.mxu1 %v2437_v28  ;;  %v920_v28 = vld [vmem:[#allocation7] sm:$0xff] }
 0x33c   :  { %2255 = vmatmul.mubr.msk.f32.gmra.mrb[8].mxu0 %vm195_vm1, %v475_v33  ;;  %2259 = vmatmul.mubr.msk.f32.gmra.mrb[10].mxu1 %vm195_vm1, %v475_v33 }
 0x33d   :  { %2428 = vmatpush1.bf16.msra.mxu0 %v2427_v31  ;;  %2440 = vmatpush1.bf16.msra.mxu1 %v2439_v32  ;;  %v923_v31 = vld [vmem:[#allocation7 + $0x18] sm:$0xff]  ;;  %v924_v32 = vld [vmem:[#allocation7 + $0x20] sm:$0xff] }
 0x33e   :  { %778 = vmatprep.mubr.f32.mxu0 %v2941_v1  ;;  %2442 = vmatprep.subr.bf16.mxu1 %v2441_v34  ;;  %v926_v34 = vld [vmem:[#allocation7 + $0x30] sm:$0xff] }
 0x33f   :  { %895 = vmatprep.mubr.f32.mxu1 %v2941_v1 }
 0x340   :  { %2260 = vmatmul.mubr.msk.f32.vlgmr.msra.gmra.mrb[10].mxu0 %vm195_vm1, %v3329_v49 }
 0x341   :  { %2444 = vmatpush1.bf16.msra.mxu1 %v2443_v36  ;;  %784 = vmatprep.mubr.f32.mxu0 %v2941_v1  ;;  %v1184_v36 = vld [vmem:[%s3834_s6 + $0x88] sm:$0xff] }
 0x344   :  { %2264 = vmatmul.mubr.msk.f32.vlgmr.msra.gmra.mrb[12].mxu1 %vm195_vm1, %v3113_v8  ;;  %2261 = vmatmul.mubr.msk.f32.gmra.mrb[12].mxu0 %vm195_vm1, %v473_v62 }
 0x345   :  { %901 = vmatprep.mubr.f32.mxu1 %v2941_v1  ;;  %790 = vmatprep.mubr.f32.mxu0 %v2941_v1 }
 0x348   :  { %2265 = vmatmul.mubr.msk.f32.gmra.mrb[14].mxu1 %vm195_vm1, %v3118_v10  ;;  %2262 = vmatmul.mubr.msk.f32.gmra.mrb[14].mxu0 %vm195_vm1, %v474_v21 }
 0x349   :  { %907 = vmatprep.mubr.f32.mxu1 %v2941_v1  ;;  %796 = vmatprep.mubr.f32.mxu0 %v2941_v1 }
 0x34c   :  { %2266 = vmatmul.mubr.msk.f32.gmra.mrb[16].mxu1 %vm195_vm1, %v3123_v11  ;;  %2263 = vmatmul.mubr.msk.f32.gmra.mrb[16].mxu0 %vm195_vm1, %v475_v33  ;;  %v925_v33 = vld [vmem:[#allocation7 + $0x28] sm:$0xff] }
 0x34d   :  { %913 = vmatprep.mubr.f32.mxu1 %v2941_v1  ;;  %1000 = vmatprep.mubr.f32.mxu0 %v2941_v1 }
 0x350   :  { %2267 = vmatmul.mubr.msk.f32.gmra.mrb[18].mxu1 %vm195_vm1, %v3128_v12 }
 0x403   :  { %v602_v8 = vpop.f32.mrb[2].mxu0  ;;  %v691_v10 = vpop.f32.mrb[4].mxu1 }
 0x404   :  { %v604_v37 = vpop.f32.mrb[3].mxu0  ;;  %v693_v38 = vpop.f32.mrb[5].mxu1 }
 0x407   :  { %v608_v39 = vpop.f32.mrb[4].mxu0  ;;  %v697_v40 = vpop.f32.mrb[6].mxu1 }
 0x408   :  { %v2447_v41 = vpack.c.bf16 %v608_v39, %v602_v8  ;;  %v2455_v42 = vpack.c.bf16 %v697_v40, %v691_v10  ;;  %v610_v43 = vpop.f32.mrb[5].mxu0  ;;  %v699_v44 = vpop.f32.mrb[7].mxu1  ;;  %v2477_v8 = vpack.c.bf16 %v1184_v36, %v1183_v3  ;;  %v1167_v10 = vld [vmem:[%s3834_s6] sm:$0xff]  ;;  %v1185_v39 = vld [vmem:[%s3834_s6 + $0x90] sm:$0xff]  ;;  %v1186_v40 = vld [vmem:[%s3834_s6 + $0x98] sm:$0xff] }
 0x409   :  { %v2445_v11 = vpack.c.bf16 %v610_v43, %v604_v37  ;;  %v2453_v45 = vpack.c.bf16 %v699_v44, %v693_v38  ;;  %v1168_v37 = vld [vmem:[%s3834_s6 + $0x8] sm:$0xff]  ;;  %v1170_v43 = vld [vmem:[%s3834_s6 + $0x18] sm:$0xff] }
 0x40a   :  { %v2479_v38 = vpack.c.bf16 %v1168_v37, %v1167_v10  ;;  %2478 = vmatprep.subr.bf16.mxu1 %v2477_v8 }
 0x40b   :  { %v614_v46 = vpop.f32.mrb[6].mxu0  ;;  %v703_v47 = vpop.f32.mrb[8].mxu1  ;;  %2446 = vmatprep.subr.bf16.mxu0 %v2445_v11  ;;  %v1187_v11 = vld [vmem:[%s3834_s6 + $0xa0] sm:$0xff] }
 0x40c   :  { %v616_v48 = vpop.f32.mrb[7].mxu0  ;;  %v705_v49 = vpop.f32.mrb[9].mxu1  ;;  %2448 = vmatpush1.bf16.msra.mxu0 %v2447_v41  ;;  %2480 = vmatpush3.bf16.msra.mxu1 %v2479_v38  ;;  %v2481_v41 = vpack.c.bf16 %v1186_v40, %v1185_v39 }
 0x40e   :  { %2482 = vmatprep.subr.bf16.mxu1 %v2481_v41 }
 0x40f   :  { %v620_v50 = vpop.f32.mrb[8].mxu0  ;;  %v709_v12 = vpop.f32.mrb[10].mxu1 }
 0x410   :  { %v2451_v51 = vpack.c.bf16 %v620_v50, %v614_v46  ;;  %v2459_v52 = vpack.c.bf16 %v709_v12, %v703_v47  ;;  %v622_v53 = vpop.f32.mrb[9].mxu0  ;;  %v711_v54 = vpop.f32.mrb[11].mxu1  ;;  %v1171_v47 = vld [vmem:[%s3834_s6 + $0x20] sm:$0xff]  ;;  %v1189_v50 = vld [vmem:[%s3834_s6 + $0xb0] sm:$0xff]  ;;  %v1190_v12 = vld [vmem:[%s3834_s6 + $0xb8] sm:$0xff] }
 0x411   :  { %v2449_v55 = vpack.c.bf16 %v622_v53, %v616_v48  ;;  %v2457_v57 = vpack.c.bf16 %v711_v54, %v705_v49  ;;  %v1172_v48 = vld [vmem:[%s3834_s6 + $0x28] sm:$0xff]  ;;  %v1174_v53 = vld [vmem:[%s3834_s6 + $0x38] sm:$0xff] }
 0x412   :  { %v2487_v49 = vpack.c.bf16 %v1172_v48, %v1171_v47 }
 0x413   :  { %v780_v58 = vpop.f32.mrb[10].mxu0  ;;  %2450 = vmatprep.subr.bf16.mxu0 %v2449_v55  ;;  %v1191_v55 = vld [vmem:[%s3834_s6 + $0xc0] sm:$0xff] }
 0x414   :  { %v782_v59 = vpop.f32.mrb[11].mxu0  ;;  %2452 = vmatpush1.bf16.msra.mxu0 %v2451_v51  ;;  %v2489_v51 = vpack.c.bf16 %v1190_v12, %v1189_v50 }
 0x415   :  { %2454 = vmatprep.subr.bf16.mxu0 %v2453_v45  ;;  %v1188_v45 = vld [vmem:[%s3834_s6 + $0xa8] sm:$0xff] }
 0x416   :  { %v2485_v46 = vpack.c.bf16 %v1188_v45, %v1187_v11 }
 0x417   :  { %v786_v60 = vpop.f32.mrb[12].mxu0  ;;  %v897_v61 = vpop.f32.mrb[12].mxu1 }
 0x418   :  { %v2463_v62 = vpack.c.bf16 %v786_v60, %v780_v58  ;;  %v788_v63 = vpop.f32.mrb[13].mxu0  ;;  %2456 = vmatpush1.bf16.msra.mxu0 %v2455_v42  ;;  %v899_v0 = vpop.f32.mrb[13].mxu1  ;;  %v1169_v42 = vld [vmem:[%s3834_s6 + $0x10] sm:$0xff]  ;;  %v1176_v60 = vld [vmem:[%s3834_s6 + $0x48] sm:$0xff] }
 0x419   :  { %v2461_v2 = vpack.c.bf16 %v788_v63, %v782_v59  ;;  %2458 = vmatprep.subr.bf16.mxu0 %v2457_v57  ;;  %v2483_v44 = vpack.c.bf16 %v1170_v43, %v1169_v42  ;;  %v1192_v57 = vld [vmem:[%s3834_s6 + $0xc8] sm:$0xff]  ;;  %v1175_v59 = vld [vmem:[%s3834_s6 + $0x40] sm:$0xff]  ;;  %v1194_v63 = vld [vmem:[%s3834_s6 + $0xd8] sm:$0xff] }
 0x41a   :  { %v2493_v58 = vpack.c.bf16 %v1192_v57, %v1191_v55 }
 0x41b   :  { %v903_v5 = vpop.f32.mrb[14].mxu1  ;;  %v792_v9 = vpop.f32.mrb[14].mxu0  ;;  %2484 = vmatpush3.bf16.msra.mxu1 %v2483_v44 }
 0x41c   :  { %v2471_v13 = vpack.c.bf16 %v903_v5, %v897_v61  ;;  %v905_v14 = vpop.f32.mrb[15].mxu1  ;;  %v794_v15 = vpop.f32.mrb[15].mxu0  ;;  %2460 = vmatpush1.bf16.msra.mxu0 %v2459_v52  ;;  %2486 = vmatprep.subr.bf16.mxu1 %v2485_v46  ;;  %v1173_v52 = vld [vmem:[%s3834_s6 + $0x30] sm:$0xff]  ;;  %v2495_v61 = vpack.c.bf16 %v1176_v60, %v1175_v59  ;;  %v1178_v5 = vld [vmem:[%s3834_s6 + $0x58] sm:$0xff] }
 0x41d   :  { %v2469_v16 = vpack.c.bf16 %v905_v14, %v899_v0  ;;  %2462 = vmatprep.subr.bf16.mxu0 %v2461_v2  ;;  %v2491_v54 = vpack.c.bf16 %v1174_v53, %v1173_v52  ;;  %v1177_v2 = vld [vmem:[%s3834_s6 + $0x50] sm:$0xff]  ;;  %v1196_v14 = vld [vmem:[%s3834_s6 + $0xe8] sm:$0xff] }
 0x41f   :  { %v798_v17 = vpop.f32.mrb[16].mxu0  ;;  %v909_v18 = vpop.f32.mrb[16].mxu1  ;;  %2488 = vmatpush3.bf16.msra.mxu1 %v2487_v49 }
 0x420   :  { %v2467_v19 = vpack.c.bf16 %v798_v17, %v792_v9  ;;  %v800_v20 = vpop.f32.mrb[17].mxu0  ;;  %2464 = vmatpush1.bf16.msra.mxu0 %v2463_v62  ;;  %v911_v21 = vpop.f32.mrb[17].mxu1  ;;  %2490 = vmatprep.subr.bf16.mxu1 %v2489_v51  ;;  %v1193_v62 = vld [vmem:[%s3834_s6 + $0xd0] sm:$0xff]  ;;  %v2499_v9 = vpack.c.bf16 %v1178_v5, %v1177_v2  ;;  %v1180_v17 = vld [vmem:[%s3834_s6 + $0x68] sm:$0xff] }
 0x421   :  { %v2465_v22 = vpack.c.bf16 %v800_v20, %v794_v15  ;;  %v2497_v0 = vpack.c.bf16 %v1194_v63, %v1193_v62  ;;  %v1198_v20 = vld [vmem:[%s3834_s6 + $0xf8] sm:$0xff] }
 0x423   :  { %v915_v23 = vpop.f32.mrb[18].mxu1  ;;  %2466 = vmatprep.subr.bf16.mxu0 %v2465_v22  ;;  %2492 = vmatpush3.bf16.msra.mxu1 %v2491_v54 }
 0x424   :  { %v2475_v24 = vpack.c.bf16 %v915_v23, %v909_v18  ;;  %v917_v26 = vpop.f32.mrb[19].mxu1  ;;  %2468 = vmatpush1.bf16.msra.mxu0 %v2467_v19  ;;  %2494 = vmatprep.subr.bf16.mxu1 %v2493_v58  ;;  %v1197_v19 = vld [vmem:[%s3834_s6 + $0xf0] sm:$0xff]  ;;  %v1182_v23 = vld [vmem:[%s3834_s6 + $0x78] sm:$0xff] }
 0x425   :  { %v2473_v27 = vpack.c.bf16 %v917_v26, %v911_v21  ;;  %2470 = vmatprep.subr.bf16.mxu0 %v2469_v16  ;;  %v1179_v16 = vld [vmem:[%s3834_s6 + $0x60] sm:$0xff]  ;;  %v1181_v21 = vld [vmem:[%s3834_s6 + $0x70] sm:$0xff]  ;;  %v2505_v22 = vpack.c.bf16 %v1198_v20, %v1197_v19 }
 0x426   :  { %v2503_v18 = vpack.c.bf16 %v1180_v17, %v1179_v16 }
 0x427   :  { %2496 = vmatpush3.bf16.msra.mxu1 %v2495_v61 }
 0x428   :  { %2472 = vmatpush1.bf16.msra.mxu0 %v2471_v13  ;;  %2498 = vmatprep.subr.bf16.mxu1 %v2497_v0  ;;  %v1195_v13 = vld [vmem:[%s3834_s6 + $0xe0] sm:$0xff]  ;;  %s2945_s6 = smov 120  }
 0x429   :  { %2474 = vmatprep.subr.bf16.mxu0 %v2473_v27  ;;  %v2501_v15 = vpack.c.bf16 %v1196_v14, %v1195_v13 }
 0x42b   :  { %2500 = vmatpush3.bf16.msra.mxu1 %v2499_v9 }
 0x42c   :  { %2476 = vmatpush1.bf16.msra.mxu0 %v2475_v24  ;;  %2502 = vmatprep.subr.bf16.mxu1 %v2501_v15  ;;  %v2507_v24 = vpack.c.bf16 %v1182_v23, %v1181_v21 }
 0x42f   :  { %1001 = vmatmul.mubr.f32.vlgmr.msra.gmra.mrb[18].mxu0 %v920_v28  ;;  %2504 = vmatpush3.bf16.msra.mxu1 %v2503_v18 }
 0x430   :  { %1006 = vmatprep.mubr.f32.mxu0 %v2941_v1  ;;  %2506 = vmatprep.subr.bf16.mxu1 %v2505_v22 }
 0x433   :  { %1007 = vmatmul.mubr.f32.gmra.mrb[20].mxu0 %v921_v29  ;;  %2508 = vmatpush3.bf16.msra.mxu1 %v2507_v24 }
 0x434   :  { %1012 = vmatprep.mubr.f32.mxu0 %v2941_v1 }
 0x437   :  { %1013 = vmatmul.mubr.f32.gmra.mrb[22].mxu0 %v922_v30 }
 0x438   :  { %1018 = vmatprep.mubr.f32.mxu0 %v2941_v1 }
 0x43b   :  { %1019 = vmatmul.mubr.f32.gmra.mrb[24].mxu0 %v923_v31 }
 0x43c   :  { %1024 = vmatprep.mubr.f32.mxu0 %v2941_v1 }
 0x43f   :  { %1025 = vmatmul.mubr.f32.gmra.mrb[26].mxu0 %v924_v32 }
 0x440   :  { %1030 = vmatprep.mubr.f32.mxu0 %v2941_v1 }
 0x443   :  { %1031 = vmatmul.mubr.f32.gmra.mrb[28].mxu0 %v925_v33 }
 0x444   :  { %1036 = vmatprep.mubr.f32.mxu0 %v2941_v1 }
 0x447   :  { %1037 = vmatmul.mubr.f32.gmra.mrb[30].mxu0 %v926_v34 }
 0x448   :  { %1042 = vmatprep.mubr.f32.mxu0 %v2941_v1 }
 0x44b   :  { %1043 = vmatmul.mubr.f32.gmra.mrb[32].mxu0 %v927_v35 }
 0x44c   :  { %1048 = vmatprep.mubr.f32.mxu0 %v2941_v1 }
 0x502   :  { %v3504_v26 = vpop.f32.mrb[18].mxu0 }
 0x503   :  { %v3506_v27 = vpop.f32.mrb[19].mxu0  ;;  %v1123_v29 = vmul.f32 %v3504_v26, %v3504_v26 }
 0x504   :  { %v1124_v33 = vmul.f32 %v3506_v27, %v3506_v27 }
 0x506   :  { %v3508_v28 = vpop.f32.mrb[20].mxu0 }
 0x507   :  { %v1097_v30 = vadd.f32 %v3508_v28, %v3504_v26  ;;  %v1125_v31 = vmul.f32 %v3508_v28, %v3508_v28  ;;  %v3516_v32 = vpop.f32.mrb[21].mxu0 }
 0x508   :  { %v1110_v34 = vadd.f32 %v3516_v32, %v3506_v27  ;;  %v1126_v35 = vmul.f32 %v3516_v32, %v3516_v32 }
 0x509   :  { %v1139_v3 = vadd.f32 %v1125_v31, %v1123_v29 }
 0x50a   :  { %v1152_v36 = vadd.f32 %v1126_v35, %v1124_v33  ;;  %v3524_v8 = vpop.f32.mrb[22].mxu0 }
 0x50b   :  { %v1098_v10 = vadd.f32 %v1097_v30, %v3524_v8  ;;  %v1127_v37 = vmul.f32 %v3524_v8, %v3524_v8  ;;  %v3529_v38 = vpop.f32.mrb[23].mxu0 }
 0x50c   :  { %v1111_v39 = vadd.f32 %v1110_v34, %v3529_v38  ;;  %v1128_v40 = vmul.f32 %v3529_v38, %v3529_v38 }
 0x50d   :  { %v1140_v41 = vadd.f32 %v1139_v3, %v1127_v37 }
 0x50e   :  { %v1153_v42 = vadd.f32 %v1152_v36, %v1128_v40  ;;  %v3534_v43 = vpop.f32.mrb[24].mxu0 }
 0x50f   :  { %v1099_v44 = vadd.f32 %v1098_v10, %v3534_v43  ;;  %v1129_v11 = vmul.f32 %v3534_v43, %v3534_v43  ;;  %v3539_v45 = vpop.f32.mrb[25].mxu0 }
 0x510   :  { %v1112_v46 = vadd.f32 %v1111_v39, %v3539_v45  ;;  %v1130_v47 = vmul.f32 %v3539_v45, %v3539_v45 }
 0x511   :  { %v1141_v48 = vadd.f32 %v1140_v41, %v1129_v11 }
 0x512   :  { %v1154_v49 = vadd.f32 %v1153_v42, %v1130_v47  ;;  %v3544_v50 = vpop.f32.mrb[26].mxu0 }
 0x513   :  { %v1100_v12 = vadd.f32 %v1099_v44, %v3544_v50  ;;  %v1131_v51 = vmul.f32 %v3544_v50, %v3544_v50  ;;  %v3549_v52 = vpop.f32.mrb[27].mxu0 }
 0x514   :  { %v1113_v53 = vadd.f32 %v1112_v46, %v3549_v52  ;;  %v1132_v54 = vmul.f32 %v3549_v52, %v3549_v52 }
 0x515   :  { %v1142_v55 = vadd.f32 %v1141_v48, %v1131_v51 }
 0x516   :  { %v1155_v57 = vadd.f32 %v1154_v49, %v1132_v54  ;;  %v3554_v58 = vpop.f32.mrb[28].mxu0 }
 0x517   :  { %v1101_v59 = vadd.f32 %v1100_v12, %v3554_v58  ;;  %v1133_v60 = vmul.f32 %v3554_v58, %v3554_v58  ;;  %v3559_v61 = vpop.f32.mrb[29].mxu0 }
 0x518   :  { %v1114_v62 = vadd.f32 %v1113_v53, %v3559_v61  ;;  %v1134_v63 = vmul.f32 %v3559_v61, %v3559_v61 }
 0x519   :  { %v1143_v0 = vadd.f32 %v1142_v55, %v1133_v60 }
 0x51a   :  { %v1156_v2 = vadd.f32 %v1155_v57, %v1134_v63  ;;  %v3564_v5 = vpop.f32.mrb[30].mxu0 }
 0x51b   :  { %v1102_v9 = vadd.f32 %v1101_v59, %v3564_v5  ;;  %v1135_v13 = vmul.f32 %v3564_v5, %v3564_v5  ;;  %v3569_v14 = vpop.f32.mrb[31].mxu0 }
 0x51c   :  { %v1115_v15 = vadd.f32 %v1114_v62, %v3569_v14  ;;  %v1136_v16 = vmul.f32 %v3569_v14, %v3569_v14 }
 0x51d   :  { %v1144_v17 = vadd.f32 %v1143_v0, %v1135_v13 }
 0x51e   :  { %v1157_v18 = vadd.f32 %v1156_v2, %v1136_v16  ;;  %v3574_v19 = vpop.f32.mrb[32].mxu0 }
 0x51f   :  { %v1103_v20 = vadd.f32 %v1102_v9, %v3574_v19  ;;  %v1137_v21 = vmul.f32 %v3574_v19, %v3574_v19  ;;  %v3579_v22 = vpop.f32.mrb[33].mxu0 }
 0x520   :  { %v1116_v23 = vadd.f32 %v1115_v15, %v3579_v22  ;;  %v1138_v24 = vmul.f32 %v3579_v22, %v3579_v22 }
 0x521   :  { %v1104_v29 = vrot.slane %v1103_v20, 4  ;;  %v1145_v30 = vadd.f32 %v1144_v17, %v1137_v21 }
 0x522   :  { %v1117_v31 = vrot.slane %v1116_v23, 4  ;;  %v1158_v33 = vadd.f32 %v1157_v18, %v1138_v24 }
 0x523   :  { %v1105_v34 = vadd.f32 %v1104_v29, %v1103_v20  ;;  %v1146_v35 = vrot.slane %v1145_v30, 4 }
 0x524   :  { %v1118_v3 = vadd.f32 %v1117_v31, %v1116_v23  ;;  %v1159_v36 = vrot.slane %v1158_v33, 4  ;;  %v1307_v31 = vld [vmem:[#allocation2] sm:$0xff] }
 0x525   :  { %v1106_v10 = vrot.slane %v1105_v34, 2  ;;  %v1147_v37 = vadd.f32 %v1146_v35, %v1145_v30  ;;  %v1308_v30 = vld [vmem:[#allocation2 + $0x8] sm:$0xff] }
 0x526   :  { %v1119_v39 = vrot.slane %v1118_v3, 2  ;;  %v1160_v40 = vadd.f32 %v1159_v36, %v1158_v33  ;;  %1315 = vmatprep.subr.mxu1 %v1308_v30  ;;  %v1501_v36 = vld [vmem:[#allocation8] sm:$0xff] }
 0x527   :  { %v1107_v41 = vadd.f32 %v1106_v10, %v1105_v34  ;;  %v1148_v42 = vrot.slane %v1147_v37, 2 }
 0x528   :  { %v1120_v44 = vadd.f32 %v1119_v39, %v1118_v3  ;;  %v1161_v11 = vrot.slane %v1160_v40, 2  ;;  %v1508_v3 = vld [vmem:[#allocation8 + $0x38] sm:$0xff] }
 0x529   :  { %v1108_v46 = vrot.slane %v1107_v41, 1  ;;  %v1149_v47 = vadd.f32 %v1148_v42, %v1147_v37  ;;  %v1507_v37 = vld [vmem:[#allocation8 + $0x30] sm:$0xff]  ;;  %v1504_v39 = vld [vmem:[#allocation8 + $0x18] sm:$0xff] }
 0x52a   :  { %v1121_v48 = vrot.slane %v1120_v44, 1  ;;  %v1162_v49 = vadd.f32 %v1161_v11, %v1160_v40  ;;  %v1510_v40 = vld [vmem:[#allocation8 + $0x48] sm:$0xff]  ;;  %v1520_v11 = vld [vmem:[#allocation8 + $0x98] sm:$0xff] }
 0x52b   :  { %v1150_v12 = vrot.slane %v1149_v47, 1  ;;  %v1109_v53 = vadd.f32 %v1108_v46, %v1107_v41  ;;  %v2511_v41 = vpack.c.bf16 %v1507_v37, %v1501_v36  ;;  %v2573_v42 = vpack.c.bf16 %v1510_v40, %v1504_v39  ;;  %v1513_v46 = vld [vmem:[#allocation8 + $0x60] sm:$0xff]  ;;  %v1592_v37 = vld [vmem:[#allocation8 + $0x2d8] sm:$0xff] }
 0x52c   :  { %v1163_v51 = vrot.slane %v1162_v49, 1  ;;  %v1122_v55 = vadd.f32 %v1121_v48, %v1120_v44  ;;  %v1514_v44 = vld [vmem:[#allocation8 + $0x68] sm:$0xff]  ;;  %v1585_v39 = vld [vmem:[#allocation8 + $0x2a0] sm:$0xff] }
 0x52d   :  { %v1151_v54 = vadd.f32 %v1150_v12, %v1149_v47  ;;  %v1519_v47 = vld [vmem:[#allocation8 + $0x90] sm:$0xff]  ;;  %v1532_v12 = vld [vmem:[#allocation8 + $0xf8] sm:$0xff] }
 0x52e   :  { %v1164_v57 = vadd.f32 %v1163_v51, %v1162_v49  ;;  %v2515_v48 = vpack.c.bf16 %v1519_v47, %v1513_v46  ;;  %v1526_v49 = vld [vmem:[#allocation8 + $0xc8] sm:$0xff]  ;;  %v1604_v46 = vld [vmem:[#allocation8 + $0x338] sm:$0xff] }
 0x52f   :  { %v1165_v59 = vsel %vm226_vm3, %v1109_v53, %v1151_v54  ;;  %v2517_v51 = vpack.c.bf16 %v1532_v12, %v1526_v49  ;;  %v1525_v53 = vld [vmem:[#allocation8 + $0xc0] sm:$0xff]  ;;  %v1531_v54 = vld [vmem:[#allocation8 + $0xf0] sm:$0xff]  ;;  %v929_v12 = vld [vmem:[#allocation7 + $0x48] sm:$0xff] }
 0x530   :  { %v1166_v60 = vsel %vm226_vm3, %v1122_v55, %v1164_v57  ;;  %v2519_v55 = vpack.c.bf16 %v1531_v54, %v1525_v53  ;;  %v1538_v57 = vld [vmem:[#allocation8 + $0x128] sm:$0xff]  ;;  %v1616_v53 = vld [vmem:[#allocation8 + $0x398] sm:$0xff] }
 0x531   :  { %1263 = vmatprep.mubr.f32.mxu1 %v1166_v60  ;;  %v1537_v60 = vld [vmem:[#allocation8 + $0x120] sm:$0xff] }
 0x532   :  { %1264 = vmatmul.mubr.f32.vlgmr.msra.gmra.mrb[20].mxu1 %v1165_v59  ;;  %v1544_v59 = vld [vmem:[#allocation8 + $0x158] sm:$0xff] }
 0x533   :  { %1379 = vmatprep.mubr.f32.mxu1 %v2941_v1  ;;  %1316 = vmatpush1.msra.mxu1 %v1307_v31  ;;  %v1567_v31 = vld [vmem:[#allocation8 + $0x210] sm:$0xff] }
 0x534   :  { %2574 = vmatprep.subr.bf16.mxu1 %v2573_v42 }
 0x605   :  { %v2325_v62 = vpop.f32.mrb[20].mxu1 }
 0x606   :  { %v2326_v63 = vpop.f32.mrb[21].mxu1 }
 0x607   :  { %v2327_v0 = vadd.f32 %v2326_v63, %v2325_v62  ;;  %v2521_v62 = vpack.c.bf16 %v1544_v59, %v1538_v57  ;;  %v1543_v63 = vld [vmem:[#allocation8 + $0x150] sm:$0xff] }
 0x608   :  { %v1615_v57 = vld [vmem:[#allocation8 + $0x390] sm:$0xff] }
 0x609   :  { %v1270_v2 = vmul.f32 0.00048828125, %v2327_v0 }
 0x60b   :  { %v1271_v9 = vmul.f32 %v1270_v2, %v1270_v2  ;;  %v1290_v23 = vrot.slane %v1270_v2, %v3194_v7 }
 0x60d   :  { %v1273_v13 = vrot.slane %v1271_v9, 7  ;;  %v2523_v9 = vpack.c.bf16 %v1543_v63, %v1537_v60  ;;  %v930_v60 = vld [vmem:[#allocation7 + $0x50] sm:$0xff]  ;;  %v1628_v63 = vld [vmem:[#allocation8 + $0x3f8] sm:$0xff] }
 0x60f   :  { %v1275_v15 = vsub.f32 %v1270_v2, %v1273_v13  ;;  %v1550_v13 = vld [vmem:[#allocation8 + $0x188] sm:$0xff] }
 0x611   :  { %v1276_v16 = vadd.f32 0.0001, %v1275_v15  ;;  %v1556_v15 = vld [vmem:[#allocation8 + $0x1b8] sm:$0xff] }
 0x613   :  { %2786 = vrsqrt.f32 %v1276_v16  ;;  %v1549_v16 = vld [vmem:[#allocation8 + $0x180] sm:$0xff] }
 0x61d   :  { %v2787_v17 = vpop.eup %2786 }
 0x61e   :  { %v1281_v18 = vrot.slane %v2787_v17, %v3185_v4  ;;  %v2525_v17 = vpack.c.bf16 %v1556_v15, %v1550_v13  ;;  %v931_v15 = vld [vmem:[#allocation7 + $0x58] sm:$0xff] }
 0x620   :  { %1283 = vrot.lane.b32.xlu1 %v1281_v18, %s2937_s21  ;;  %v1555_v18 = vld [vmem:[#allocation8 + $0x1b0] sm:$0xff] }
 0x692   :  { %v1284_v20 = vpop.permute.xlu1 %1283 }
 0x693   :  { %v1286_v21 = vmul.f32 %v1284_v20, %v3191_v6  ;;  %v1502_v6 = vld [vmem:[#allocation8 + $0x8] sm:$0xff]  ;;  %v2527_v20 = vpack.c.bf16 %v1555_v18, %v1549_v16 }
 0x694   :  { %v2509_v10 = vpack.c.bf16 %v1508_v3, %v1502_v6  ;;  %v1579_v3 = vld [vmem:[#allocation8 + $0x270] sm:$0xff]  ;;  %v1634_v16 = vld [vmem:[#allocation8 + $0x428] sm:$0xff] }
 0x695   :  { %1292 = vrot.lane.b32.xlu1 %v1286_v21, %s2945_s6 }
 0x696   :  { %2510 = vmatprep.subr.bf16.mxu0 %v2509_v10  ;;  %v1586_v10 = vld [vmem:[#allocation8 + $0x2a8] sm:$0xff] }
 0x697   :  { %2512 = vmatpush1.bf16.msra.mxu0 %v2511_v41  ;;  %v2537_v40 = vpack.c.bf16 %v1592_v37, %v1586_v10  ;;  %v1591_v41 = vld [vmem:[#allocation8 + $0x2d0] sm:$0xff]  ;;  %v1528_v10 = vld [vmem:[#allocation8 + $0xd8] sm:$0xff]  ;;  %v1534_v37 = vld [vmem:[#allocation8 + $0x108] sm:$0xff] }
 0x698   :  { %v2539_v42 = vpack.c.bf16 %v1591_v41, %v1585_v39  ;;  %v1527_v41 = vld [vmem:[#allocation8 + $0xd0] sm:$0xff] }
 0x707   :  { %v1293_v24 = vpop.permute.xlu1 %1292 }
 0x708   :  { %v1295_v29 = vmul.f32 %v1293_v24, %v1290_v23  ;;  %v1562_v23 = vld [vmem:[#allocation8 + $0x1e8] sm:$0xff]  ;;  %v1568_v24 = vld [vmem:[#allocation8 + $0x218] sm:$0xff] }
 0x709   :  { %v2529_v30 = vpack.c.bf16 %v1568_v24, %v1562_v23  ;;  %v1639_v23 = vld [vmem:[#allocation8 + $0x450] sm:$0xff] }
 0x70a   :  { %1297 = vrot.lane.b32.xlu0 %v1295_v29, %s2930_s19  ;;  %v1561_v29 = vld [vmem:[#allocation8 + $0x1e0] sm:$0xff] }
 0x77c   :  { %v1298_v33 = vpop.permute.xlu0 %1297 }
 0x77d   :  { %v1300_v34 = vsub.f32 %v3180_v56, %v1298_v33  ;;  %v2513_v56 = vpack.c.bf16 %v1520_v11, %v1514_v44  ;;  %v1574_v33 = vld [vmem:[#allocation8 + $0x248] sm:$0xff]  ;;  %v928_v44 = vld [vmem:[#allocation7 + $0x40] sm:$0xff] }
 0x77e   :  { %v1598_v11 = vld [vmem:[#allocation8 + $0x308] sm:$0xff]  ;;  %1049 = vmatmul.mubr.f32.gmra.mrb[34].mxu0 %v928_v44  ;;  %v1540_v44 = vld [vmem:[#allocation8 + $0x138] sm:$0xff] }
 0x77f   :  { %v1302_v35 = vrot.slane %v1300_v34, 6  ;;  %2514 = vmatprep.subr.bf16.mxu0 %v2513_v56  ;;  %v1580_v34 = vld [vmem:[#allocation8 + $0x278] sm:$0xff]  ;;  %v2541_v47 = vpack.c.bf16 %v1604_v46, %v1598_v11  ;;  %v1597_v56 = vld [vmem:[#allocation8 + $0x300] sm:$0xff]  ;;  %1054 = vmatprep.mubr.f32.mxu0 %v2941_v1  ;;  %v1546_v11 = vld [vmem:[#allocation8 + $0x168] sm:$0xff] }
 0x780   :  { %2516 = vmatpush1.bf16.msra.mxu0 %v2515_v48  ;;  %v2533_v6 = vpack.c.bf16 %v1580_v34, %v1574_v33  ;;  %v1603_v48 = vld [vmem:[#allocation8 + $0x330] sm:$0xff]  ;;  %v1522_v33 = vld [vmem:[#allocation8 + $0xa8] sm:$0xff] }
 0x781   :  { %1303 = vrot.lane.b32.xlu1 %v1302_v35, %s2945_s6  ;;  %2518 = vmatprep.subr.bf16.mxu0 %v2517_v51  ;;  %v1573_v35 = vld [vmem:[#allocation8 + $0x240] sm:$0xff]  ;;  %v2543_v49 = vpack.c.bf16 %v1603_v48, %v1597_v56  ;;  %v1610_v51 = vld [vmem:[#allocation8 + $0x368] sm:$0xff]  ;;  %v1539_v56 = vld [vmem:[#allocation8 + $0x130] sm:$0xff] }
 0x782   :  { %v2535_v36 = vpack.c.bf16 %v1579_v3, %v1573_v35  ;;  %1055 = vmatmul.mubr.f32.gmra.mrb[36].mxu0 %v929_v12  ;;  %v2545_v54 = vpack.c.bf16 %v1616_v53, %v1610_v51  ;;  %v1521_v3 = vld [vmem:[#allocation8 + $0xa0] sm:$0xff]  ;;  %v1558_v12 = vld [vmem:[#allocation8 + $0x1c8] sm:$0xff] }
 0x783   :  { %1060 = vmatprep.mubr.f32.mxu0 %v2941_v1  ;;  %v1545_v48 = vld [vmem:[#allocation8 + $0x160] sm:$0xff] }
 0x784   :  { %2520 = vmatpush1.bf16.msra.mxu0 %v2519_v55  ;;  %v1609_v55 = vld [vmem:[#allocation8 + $0x360] sm:$0xff]  ;;  %v2587_v51 = vpack.c.bf16 %v1545_v48, %v1539_v56  ;;  %v1636_v56 = vld [vmem:[#allocation8 + $0x438] sm:$0xff]  ;;  %v1642_v48 = vld [vmem:[#allocation8 + $0x468] sm:$0xff] }
 0x785   :  { %2522 = vmatprep.subr.bf16.mxu0 %v2521_v62  ;;  %v2547_v59 = vpack.c.bf16 %v1615_v57, %v1609_v55  ;;  %v1622_v62 = vld [vmem:[#allocation8 + $0x3c8] sm:$0xff]  ;;  %v1557_v55 = vld [vmem:[#allocation8 + $0x1c0] sm:$0xff]  ;;  %v1564_v57 = vld [vmem:[#allocation8 + $0x1f8] sm:$0xff] }
 0x786   :  { %1061 = vmatmul.mubr.f32.gmra.mrb[38].mxu0 %v930_v60 }
 0x787   :  { %1066 = vmatprep.mubr.f32.mxu0 %v2941_v1 }
 0x788   :  { %2524 = vmatpush1.bf16.msra.mxu0 %v2523_v9  ;;  %v1627_v9 = vld [vmem:[#allocation8 + $0x3f0] sm:$0xff] }
 0x789   :  { %2526 = vmatprep.subr.bf16.mxu0 %v2525_v17  ;;  %v1640_v17 = vld [vmem:[#allocation8 + $0x458] sm:$0xff] }
 0x78a   :  { %1067 = vmatmul.mubr.f32.gmra.mrb[40].mxu0 %v931_v15  ;;  %v2553_v18 = vpack.c.bf16 %v1640_v17, %v1634_v16  ;;  %v1575_v16 = vld [vmem:[#allocation8 + $0x250] sm:$0xff]  ;;  %v1581_v17 = vld [vmem:[#allocation8 + $0x280] sm:$0xff] }
 0x78b   :  { %1072 = vmatprep.mubr.f32.mxu0 %v2941_v1 }
 0x78c   :  { %2528 = vmatpush1.bf16.msra.mxu0 %v2527_v20  ;;  %v1633_v20 = vld [vmem:[#allocation8 + $0x420] sm:$0xff] }
 0x78d   :  { %2530 = vmatprep.subr.bf16.mxu0 %v2529_v30  ;;  %v2555_v24 = vpack.c.bf16 %v1639_v23, %v1633_v20  ;;  %v1503_v30 = vld [vmem:[#allocation8 + $0x10] sm:$0xff]  ;;  %v1594_v20 = vld [vmem:[#allocation8 + $0x2e8] sm:$0xff]  ;;  %v2599_v23 = vpack.c.bf16 %v1581_v17, %v1575_v16 }
 0x78e   :  { %v1658_v17 = vld [vmem:[#allocation8 + $0x4e8] sm:$0xff] }
 0x7f3   :  { %v1304_v0 = vpop.permute.xlu1 %1303 }
 0x7f4   :  { %v1306_v2 = vsel %vm338_vm5, %v1286_v21, %v1304_v0  ;;  %v2531_v21 = vpack.c.bf16 %v1567_v31, %v1561_v29  ;;  %v2549_v0 = vpack.c.bf16 %v1628_v63, %v1622_v62  ;;  %v932_v29 = vld [vmem:[#allocation7 + $0x60] sm:$0xff]  ;;  %v1563_v63 = vld [vmem:[#allocation8 + $0x1f0] sm:$0xff] }
 0x7f5   :  { %1310 = vrot.lane.b32.xlu0 %v1306_v2, %s2945_s6  ;;  %v1621_v2 = vld [vmem:[#allocation8 + $0x3c0] sm:$0xff]  ;;  %1073 = vmatmul.mubr.f32.gmra.mrb[42].mxu0 %v932_v29  ;;  %v1587_v29 = vld [vmem:[#allocation8 + $0x2b0] sm:$0xff] }
 0x7f6   :  { %2532 = vmatpush1.bf16.msra.mxu0 %v2531_v21  ;;  %v2551_v13 = vpack.c.bf16 %v1627_v9, %v1621_v2  ;;  %1078 = vmatprep.mubr.f32.mxu0 %v2941_v1  ;;  %v1509_v31 = vld [vmem:[#allocation8 + $0x40] sm:$0xff]  ;;  %v1516_v21 = vld [vmem:[#allocation8 + $0x78] sm:$0xff]  ;;  %v1582_v9 = vld [vmem:[#allocation8 + $0x288] sm:$0xff] }
 0x7f7   :  { %2534 = vmatprep.subr.bf16.mxu0 %v2533_v6  ;;  %v2575_v34 = vpack.c.bf16 %v1509_v31, %v1503_v30  ;;  %v2577_v35 = vpack.c.bf16 %v1522_v33, %v1516_v21  ;;  %v1515_v6 = vld [vmem:[#allocation8 + $0x70] sm:$0xff]  ;;  %v1576_v2 = vld [vmem:[#allocation8 + $0x258] sm:$0xff]  ;;  %v1593_v30 = vld [vmem:[#allocation8 + $0x2e0] sm:$0xff] }
 0x7f8   :  { %v2579_v39 = vpack.c.bf16 %v1521_v3, %v1515_v6  ;;  %v2597_v15 = vpack.c.bf16 %v1582_v9, %v1576_v2  ;;  %v1600_v31 = vld [vmem:[#allocation8 + $0x318] sm:$0xff]  ;;  %v1606_v21 = vld [vmem:[#allocation8 + $0x348] sm:$0xff]  ;;  %v2603_v33 = vpack.c.bf16 %v1593_v30, %v1587_v29  ;;  %v1605_v6 = vld [vmem:[#allocation8 + $0x340] sm:$0xff] }
 0x7f9   :  { %v1612_v3 = vld [vmem:[#allocation8 + $0x378] sm:$0xff]  ;;  %v1654_v2 = vld [vmem:[#allocation8 + $0x4c8] sm:$0xff]  ;;  %v1647_v9 = vld [vmem:[#allocation8 + $0x490] sm:$0xff] }
 0x7fa   :  { %2536 = vmatpush1.bf16.msra.mxu0 %v2535_v36  ;;  %v1660_v29 = vld [vmem:[#allocation8 + $0x4f8] sm:$0xff]  ;;  %v933_v30 = vld [vmem:[#allocation7 + $0x68] sm:$0xff] }
 0x7fb   :  { %2538 = vmatprep.subr.bf16.mxu0 %v2537_v40  ;;  %v2581_v40 = vpack.c.bf16 %v1534_v37, %v1528_v10  ;;  %1079 = vmatmul.mubr.f32.gmra.mrb[44].mxu0 %v933_v30 }
 0x7fc   :  { %1084 = vmatprep.mubr.f32.mxu0 %v2941_v1 }
 0x7fe   :  { %2540 = vmatpush1.bf16.msra.mxu0 %v2539_v42  ;;  %v1533_v42 = vld [vmem:[#allocation8 + $0x100] sm:$0xff] }
 0x7ff   :  { %2542 = vmatprep.subr.bf16.mxu0 %v2541_v47  ;;  %v2583_v46 = vpack.c.bf16 %v1533_v42, %v1527_v41  ;;  %v2585_v47 = vpack.c.bf16 %v1546_v11, %v1540_v44  ;;  %v1624_v41 = vld [vmem:[#allocation8 + $0x3d8] sm:$0xff]  ;;  %v1630_v42 = vld [vmem:[#allocation8 + $0x408] sm:$0xff] }
 0x800   :  { %v2613_v11 = vpack.c.bf16 %v1630_v42, %v1624_v41  ;;  %v934_v41 = vld [vmem:[#allocation7 + $0x70] sm:$0xff] }
 0x801   :  { %1085 = vmatmul.mubr.f32.gmra.mrb[46].mxu0 %v934_v41 }
 0x802   :  { %2544 = vmatpush1.bf16.msra.mxu0 %v2543_v49  ;;  %v1552_v49 = vld [vmem:[#allocation8 + $0x198] sm:$0xff]  ;;  %1090 = vmatprep.mubr.f32.mxu0 %v2941_v1 }
 0x803   :  { %2546 = vmatprep.subr.bf16.mxu0 %v2545_v54  ;;  %v2589_v53 = vpack.c.bf16 %v1558_v12, %v1552_v49  ;;  %v1551_v54 = vld [vmem:[#allocation8 + $0x190] sm:$0xff]  ;;  %v2617_v12 = vpack.c.bf16 %v1642_v48, %v1636_v56  ;;  %v1682_v48 = vld [vmem:[#allocation8 + $0x5a8] sm:$0xff]  ;;  %v1512_v1 = vld [vmem:[#allocation8 + $0x58] sm:$0xff] }
 0x804   :  { %v2591_v60 = vpack.c.bf16 %v1557_v55, %v1551_v54  ;;  %v1646_v55 = vld [vmem:[#allocation8 + $0x488] sm:$0xff] }
 0x806   :  { %2548 = vmatpush1.bf16.msra.mxu0 %v2547_v59  ;;  %v1570_v59 = vld [vmem:[#allocation8 + $0x228] sm:$0xff] }
 0x807   :  { %2550 = vmatprep.subr.bf16.mxu0 %v2549_v0  ;;  %v2593_v62 = vpack.c.bf16 %v1570_v59, %v1564_v57  ;;  %v1569_v0 = vld [vmem:[#allocation8 + $0x220] sm:$0xff]  ;;  %v1652_v57 = vld [vmem:[#allocation8 + $0x4b8] sm:$0xff] }
 0x808   :  { %v2557_v59 = vpack.c.bf16 %v1652_v57, %v1646_v55  ;;  %v1684_v57 = vld [vmem:[#allocation8 + $0x5b8] sm:$0xff] }
 0x80a   :  { %2552 = vmatpush1.bf16.msra.mxu0 %v2551_v13  ;;  %v2595_v13 = vpack.c.bf16 %v1569_v0, %v1563_v63  ;;  %v1648_v63 = vld [vmem:[#allocation8 + $0x498] sm:$0xff] }
 0x80b   :  { %2554 = vmatprep.subr.bf16.mxu0 %v2553_v18  ;;  %v1588_v18 = vld [vmem:[#allocation8 + $0x2b8] sm:$0xff] }
 0x80e   :  { %2556 = vmatpush1.bf16.msra.mxu0 %v2555_v24  ;;  %v2601_v24 = vpack.c.bf16 %v1594_v20, %v1588_v18  ;;  %v1664_v18 = vld [vmem:[#allocation8 + $0x518] sm:$0xff] }
 0x80f   :  { %2558 = vmatprep.subr.bf16.mxu0 %v2557_v59  ;;  %v2561_v20 = vpack.c.bf16 %v1664_v18, %v1658_v17  ;;  %v1690_v59 = vld [vmem:[#allocation8 + $0x5e8] sm:$0xff] }
 0x867   :  { %v1311_v36 = vpop.permute.xlu0 %1310 }
 0x868   :  { %2268 = vmatmul.mubr.msk.f32.vlgmr.msra.gmra.mrb[22].mxu1 %vm1312_vm7, %v1311_v36  ;;  %v1618_v36 = vld [vmem:[#allocation8 + $0x3a8] sm:$0xff] }
 0x869   :  { %2576 = vmatpush1.bf16.msra.mxu1 %v2575_v34  ;;  %v2605_v34 = vpack.c.bf16 %v1606_v21, %v1600_v31  ;;  %v2609_v37 = vpack.c.bf16 %v1618_v36, %v1612_v3  ;;  %v1666_v21 = vld [vmem:[#allocation8 + $0x528] sm:$0xff]  ;;  %v1676_v36 = vld [vmem:[#allocation8 + $0x578] sm:$0xff] }
 0x86a   :  { %2578 = vmatprep.subr.bf16.mxu1 %v2577_v35  ;;  %v1599_v35 = vld [vmem:[#allocation8 + $0x310] sm:$0xff]  ;;  %v1670_v3 = vld [vmem:[#allocation8 + $0x548] sm:$0xff] }
 0x86b   :  { %v2607_v10 = vpack.c.bf16 %v1605_v6, %v1599_v35  ;;  %v1665_v35 = vld [vmem:[#allocation8 + $0x520] sm:$0xff] }
 0x86d   :  { %2580 = vmatpush1.bf16.msra.mxu1 %v2579_v39  ;;  %v1611_v39 = vld [vmem:[#allocation8 + $0x370] sm:$0xff] }
 0x86e   :  { %2582 = vmatprep.subr.bf16.mxu1 %v2581_v40  ;;  %v1617_v40 = vld [vmem:[#allocation8 + $0x3a0] sm:$0xff] }
 0x86f   :  { %v2611_v44 = vpack.c.bf16 %v1617_v40, %v1611_v39  ;;  %v1675_v39 = vld [vmem:[#allocation8 + $0x570] sm:$0xff]  ;;  %v1672_v40 = vld [vmem:[#allocation8 + $0x558] sm:$0xff] }
 0x871   :  { %2584 = vmatpush1.bf16.msra.mxu1 %v2583_v46  ;;  %v1623_v46 = vld [vmem:[#allocation8 + $0x3d0] sm:$0xff] }
 0x872   :  { %2586 = vmatprep.subr.bf16.mxu1 %v2585_v47  ;;  %v1629_v47 = vld [vmem:[#allocation8 + $0x400] sm:$0xff] }
 0x873   :  { %v2615_v49 = vpack.c.bf16 %v1629_v47, %v1623_v46  ;;  %v1677_v47 = vld [vmem:[#allocation8 + $0x580] sm:$0xff] }
 0x875   :  { %2588 = vmatpush1.bf16.msra.mxu1 %v2587_v51  ;;  %v1635_v51 = vld [vmem:[#allocation8 + $0x430] sm:$0xff] }
 0x876   :  { %2590 = vmatprep.subr.bf16.mxu1 %v2589_v53  ;;  %v1641_v53 = vld [vmem:[#allocation8 + $0x460] sm:$0xff] }
 0x877   :  { %v2619_v54 = vpack.c.bf16 %v1641_v53, %v1635_v51  ;;  %v1681_v53 = vld [vmem:[#allocation8 + $0x5a0] sm:$0xff] }
 0x879   :  { %2592 = vmatpush1.bf16.msra.mxu1 %v2591_v60  ;;  %v1645_v60 = vld [vmem:[#allocation8 + $0x480] sm:$0xff] }
 0x87a   :  { %2594 = vmatprep.subr.bf16.mxu1 %v2593_v62  ;;  %v1651_v62 = vld [vmem:[#allocation8 + $0x4b0] sm:$0xff] }
 0x87b   :  { %v2559_v0 = vpack.c.bf16 %v1651_v62, %v1645_v60  ;;  %v1683_v60 = vld [vmem:[#allocation8 + $0x5b0] sm:$0xff]  ;;  %v2633_v62 = vpack.c.bf16 %v1690_v59, %v1684_v57 }
 0x87d   :  { %2596 = vmatpush1.bf16.msra.mxu1 %v2595_v13  ;;  %v1653_v13 = vld [vmem:[#allocation8 + $0x4c0] sm:$0xff]  ;;  %2560 = vmatpush1.bf16.msra.mxu0 %v2559_v0 }
 0x87e   :  { %2598 = vmatprep.subr.bf16.mxu1 %v2597_v15  ;;  %v2621_v15 = vpack.c.bf16 %v1654_v2, %v1648_v63  ;;  %v2623_v16 = vpack.c.bf16 %v1653_v13, %v1647_v9  ;;  %2562 = vmatprep.subr.bf16.mxu0 %v2561_v20  ;;  %v1689_v63 = vld [vmem:[#allocation8 + $0x5e0] sm:$0xff]  ;;  %v1506_v2 = vld [vmem:[#allocation8 + $0x28] sm:$0xff]  ;;  %v3604_v13 = vpop.f32.mrb[34].mxu0 }
 0x87f   :  { %v2635_v0 = vpack.c.bf16 %v1689_v63, %v1683_v60  ;;  %v2637_v9 = vpack.c.bf16 %v1512_v1, %v1506_v2  ;;  %v1523_v60 = vld [vmem:[#allocation8 + $0xb0] sm:$0xff] }
 0x881   :  { %2600 = vmatpush1.bf16.msra.mxu1 %v2599_v23  ;;  %v1657_v23 = vld [vmem:[#allocation8 + $0x4e0] sm:$0xff] }
 0x882   :  { %2602 = vmatprep.subr.bf16.mxu1 %v2601_v24  ;;  %v1663_v24 = vld [vmem:[#allocation8 + $0x510] sm:$0xff] }
 0x883   :  { %v2563_v31 = vpack.c.bf16 %v1663_v24, %v1657_v23 }
 0x885   :  { %2604 = vmatpush1.bf16.msra.mxu1 %v2603_v33  ;;  %v1659_v33 = vld [vmem:[#allocation8 + $0x4f0] sm:$0xff]  ;;  %2564 = vmatpush1.bf16.msra.mxu0 %v2563_v31 }
 0x886   :  { %2606 = vmatprep.subr.bf16.mxu1 %v2605_v34  ;;  %v2625_v34 = vpack.c.bf16 %v1666_v21, %v1660_v29  ;;  %v2627_v6 = vpack.c.bf16 %v1665_v35, %v1659_v33 }
 0x889   :  { %2608 = vmatpush1.bf16.msra.mxu1 %v2607_v10  ;;  %v2565_v10 = vpack.c.bf16 %v1676_v36, %v1670_v3 }
 0x88a   :  { %2610 = vmatprep.subr.bf16.mxu1 %v2609_v37  ;;  %v1669_v37 = vld [vmem:[#allocation8 + $0x540] sm:$0xff] }
 0x88b   :  { %v2567_v42 = vpack.c.bf16 %v1675_v39, %v1669_v37  ;;  %2566 = vmatprep.subr.bf16.mxu0 %v2565_v10 }
 0x88d   :  { %2612 = vmatpush1.bf16.msra.mxu1 %v2611_v44  ;;  %v1678_v44 = vld [vmem:[#allocation8 + $0x588] sm:$0xff]  ;;  %2568 = vmatpush1.bf16.msra.mxu0 %v2567_v42 }
 0x88e   :  { %2614 = vmatprep.subr.bf16.mxu1 %v2613_v11  ;;  %v1671_v11 = vld [vmem:[#allocation8 + $0x550] sm:$0xff]  ;;  %v2629_v46 = vpack.c.bf16 %v1678_v44, %v1672_v40 }
 0x88f   :  { %v2631_v56 = vpack.c.bf16 %v1677_v47, %v1671_v11  ;;  %v1511_v47 = vld [vmem:[#allocation8 + $0x50] sm:$0xff] }
 0x891   :  { %2616 = vmatpush1.bf16.msra.mxu1 %v2615_v49  ;;  %v1688_v49 = vld [vmem:[#allocation8 + $0x5d8] sm:$0xff] }
 0x892   :  { %2618 = vmatprep.subr.bf16.mxu1 %v2617_v12  ;;  %v935_v12 = vld [vmem:[#allocation7 + $0x78] sm:$0xff]  ;;  %v2569_v51 = vpack.c.bf16 %v1688_v49, %v1682_v48  ;;  %v1518_v48 = vld [vmem:[#allocation8 + $0x88] sm:$0xff] }
 0x893   :  { %1091 = vmatmul.mubr.f32.gmra.mrb[48].mxu0 %v935_v12  ;;  %v1524_v49 = vld [vmem:[#allocation8 + $0xb8] sm:$0xff] }
 0x894   :  { %2570 = vmatprep.subr.bf16.mxu0 %v2569_v51  ;;  %v1517_v51 = vld [vmem:[#allocation8 + $0x80] sm:$0xff] }
 0x895   :  { %2620 = vmatpush1.bf16.msra.mxu1 %v2619_v54  ;;  %v1687_v54 = vld [vmem:[#allocation8 + $0x5d0] sm:$0xff] }
 0x896   :  { %2622 = vmatprep.subr.bf16.mxu1 %v2621_v15  ;;  %v2571_v55 = vpack.c.bf16 %v1687_v54, %v1681_v53  ;;  %v3606_v15 = vpop.f32.mrb[35].mxu0 }
 0x898   :  { %2572 = vmatpush1.bf16.msra.mxu0 %v2571_v55 }
 0x899   :  { %2624 = vmatpush1.bf16.msra.mxu1 %v2623_v16  ;;  %2638 = vmatprep.subr.bf16.mxu0 %v2637_v9  ;;  %v3608_v16 = vpop.f32.mrb[36].mxu0 }
 0x89a   :  { %2626 = vmatprep.subr.bf16.mxu1 %v2625_v34  ;;  %v3610_v17 = vpop.f32.mrb[37].mxu0 }
 0x89b   :  { %v3612_v18 = vpop.f32.mrb[38].mxu0 }
 0x89c   :  { %v3614_v20 = vpop.f32.mrb[39].mxu0 }
 0x89d   :  { %2628 = vmatpush1.bf16.msra.mxu1 %v2627_v6  ;;  %v3616_v23 = vpop.f32.mrb[40].mxu0 }
 0x89e   :  { %2630 = vmatprep.subr.bf16.mxu1 %v2629_v46  ;;  %v3618_v24 = vpop.f32.mrb[41].mxu0  ;;  %v1505_v46 = vld [vmem:[#allocation8 + $0x20] sm:$0xff] }
 0x8a1   :  { %2632 = vmatpush1.bf16.msra.mxu1 %v2631_v56 }
 0x8a2   :  { %2634 = vmatprep.subr.bf16.mxu1 %v2633_v62  ;;  %v1536_v62 = vld [vmem:[#allocation8 + $0x118] sm:$0xff] }
 0x8a5   :  { %2636 = vmatpush1.bf16.msra.mxu1 %v2635_v0 }
 0x8c8   :  { %v3620_v29 = vpop.f32.mrb[42].mxu0 }
 0x8c9   :  { %v3622_v30 = vpop.f32.mrb[43].mxu0 }
 0x93b   :  { %v1381_v31 = vpop.f32.mrb[22].mxu1 }
 0x93c   :  { %v1383_v21 = vpop.f32.mrb[23].mxu1 }
 0x93d   :  { %v1388_v33 = vcombine.low %v1381_v31, %v1383_v21  ;;  %v2641_v31 = vpack.c.bf16 %v1524_v49, %v1518_v48 }
 0x93f   :  { %v1395_v34 = vrot.slane %v1388_v33, %v3305_v25 }
 0x941   :  { %v1396_v35 = vcombine.high %v1395_v34, %v1395_v34  ;;  %v1403_v6 = vrot.slane %v1395_v34, %v3305_v25 }
 0x943   :  { %v1410_v3 = vrot.slane %v1396_v35, %v3305_v25  ;;  %v1414_v36 = vrot.slane %v1403_v6, %v3194_v7  ;;  %v1418_v10 = vrot.slane %v1403_v6, %v3185_v4  ;;  %v1447_v37 = vcombine.high %v1403_v6, %v1403_v6 }
 0x945   :  { %v3630_v39 = vrot.slane %v1410_v3, %v3194_v7  ;;  %v3633_v40 = vrot.slane %v1410_v3, %v3185_v4  ;;  %v1448_v41 = vcombine.high %v1410_v3, %v1410_v3  ;;  %v1452_v42 = vrot.slane %v1447_v37, %v3194_v7 }
 0x946   :  { %v1456_v44 = vrot.slane %v1447_v37, %v3185_v4  ;;  %v1432_v11 = vmul.f32 %v1418_v10, %v3506_v27  ;;  %v1431_v25 = vmul.f32 %v1414_v36, %v3504_v26  ;;  %v1434_v56 = vmul.f32 %v1418_v10, %v3516_v32  ;;  %v1530_v26 = vld [vmem:[#allocation8 + $0xe8] sm:$0xff] }
 0x947   :  { %v1433_v12 = vmul.f32 %v1414_v36, %v3508_v28  ;;  %v1436_v53 = vmul.f32 %v1418_v10, %v3529_v38  ;;  %v1435_v54 = vmul.f32 %v1414_v36, %v3524_v8  ;;  %v1438_v55 = vmul.f32 %v1418_v10, %v3539_v45 }
 0x948   :  { %v1470_v57 = vadd.f32 %v1456_v44, %v1432_v11  ;;  %v1469_v59 = vadd.f32 %v1452_v42, %v1431_v25  ;;  %v1472_v27 = vadd.f32 %v1456_v44, %v1434_v56  ;;  %v1437_v63 = vmul.f32 %v1414_v36, %v3534_v43  ;;  %v1542_v25 = vld [vmem:[#allocation8 + $0x148] sm:$0xff] }
 0x949   :  { %v1471_v32 = vadd.f32 %v1452_v42, %v1433_v12  ;;  %v1474_v0 = vadd.f32 %v1456_v44, %v1436_v53  ;;  %v1473_v2 = vadd.f32 %v1452_v42, %v1435_v54  ;;  %v1476_v1 = vadd.f32 %v1456_v44, %v1438_v55  ;;  %v1554_v55 = vld [vmem:[#allocation8 + $0x1a8] sm:$0xff] }
 0x94a   :  { %v3645_v28 = vmax.f32 %v1470_v57, 0.0  ;;  %v3647_v9 = vmax.f32 %v1469_v59, 0.0  ;;  %v2639_v38 = vpack.c.bf16 %v1511_v47, %v1505_v46  ;;  %v1475_v8 = vadd.f32 %v1452_v42, %v1437_v63  ;;  %v1548_v46 = vld [vmem:[#allocation8 + $0x178] sm:$0xff] }
 0x94b   :  { %v2643_v45 = vpack.c.bf16 %v1523_v60, %v1517_v51  ;;  %v2645_v21 = vpack.c.bf16 %v1536_v62, %v1530_v26  ;;  %v3651_v33 = vmax.f32 %v1472_v27, 0.0  ;;  %v1440_v43 = vmul.f32 %v3633_v40, %v3549_v52  ;;  %v1553_v27 = vld [vmem:[#allocation8 + $0x1a0] sm:$0xff]  ;;  %v1559_v60 = vld [vmem:[#allocation8 + $0x1d0] sm:$0xff]  ;;  %v1566_v62 = vld [vmem:[#allocation8 + $0x208] sm:$0xff] }
 0x94c   :  { %1757 = vmatprep.mubr.f32.mxu0 %v3645_v28  ;;  %1870 = vmatprep.mubr.f32.mxu1 %v3645_v28  ;;  %v1464_v34 = vrot.slane %v1448_v41, %v3185_v4  ;;  %v1439_v35 = vmul.f32 %v3630_v39, %v3544_v50  ;;  %v1460_v6 = vrot.slane %v1448_v41, %v3194_v7  ;;  %v3671_v37 = vmax.f32 %v1471_v32, 0.0  ;;  %v1529_v41 = vld [vmem:[#allocation8 + $0xe0] sm:$0xff]  ;;  %v1572_v63 = vld [vmem:[#allocation8 + $0x238] sm:$0xff] }
 0x94d   :  { %1758 = vmatmul.mubr.f32.vlgmr.msra.gmra.mrb[50].mxu0 %v3647_v9  ;;  %1871 = vmatmul.mubr.f32.vlgmr.msra.gmra.mrb[24].mxu1 %v3647_v9  ;;  %v1442_v3 = vmul.f32 %v3633_v40, %v3559_v61  ;;  %v1441_v36 = vmul.f32 %v3630_v39, %v3554_v58  ;;  %v1444_v10 = vmul.f32 %v3633_v40, %v3569_v14  ;;  %v1535_v61 = vld [vmem:[#allocation8 + $0x110] sm:$0xff]  ;;  %v3673_v11 = vmax.f32 %v1474_v0, 0.0 }
 0x94e   :  { %2640 = vmatpush1.bf16.msra.mxu0 %v2639_v38  ;;  %1763 = vmatprep.mubr.f32.mxu0 %v3651_v33  ;;  %v1478_v52 = vadd.f32 %v1464_v34, %v1440_v43  ;;  %v1443_v50 = vmul.f32 %v3630_v39, %v3564_v5  ;;  %v1477_v42 = vadd.f32 %v1460_v6, %v1439_v35  ;;  %v3687_v12 = vmax.f32 %v1473_v2, 0.0  ;;  %v1571_v38 = vld [vmem:[#allocation8 + $0x230] sm:$0xff]  ;;  %v1577_v35 = vld [vmem:[#allocation8 + $0x260] sm:$0xff] }
 0x94f   :  { %1876 = vmatprep.mubr.f32.mxu1 %v3651_v33  ;;  %2642 = vmatprep.subr.bf16.mxu0 %v2641_v31  ;;  %v1480_v44 = vadd.f32 %v1464_v34, %v1442_v3  ;;  %v1479_v58 = vadd.f32 %v1460_v6, %v1441_v36  ;;  %v1482_v47 = vadd.f32 %v1464_v34, %v1444_v10  ;;  %v3691_v54 = vmax.f32 %v1476_v1, 0.0  ;;  %v1565_v1 = vld [vmem:[#allocation8 + $0x200] sm:$0xff]  ;;  %v1578_v31 = vld [vmem:[#allocation8 + $0x268] sm:$0xff] }
 0x950   :  { %v3675_v56 = vadd.f32 %v1460_v6, %v1443_v50  ;;  %v1446_v5 = vmul.f32 %v3633_v40, %v3579_v22  ;;  %v1445_v14 = vmul.f32 %v3630_v39, %v3574_v19  ;;  %v2647_v48 = vpack.c.bf16 %v1535_v61, %v1529_v41  ;;  %v1541_v22 = vld [vmem:[#allocation8 + $0x140] sm:$0xff]  ;;  %v1547_v40 = vld [vmem:[#allocation8 + $0x170] sm:$0xff]  ;;  %v1560_v19 = vld [vmem:[#allocation8 + $0x1d8] sm:$0xff] }
 0x951   :  { %1764 = vmatmul.mubr.f32.gmra.mrb[52].mxu0 %v3671_v37  ;;  %1877 = vmatmul.mubr.f32.gmra.mrb[26].mxu1 %v3671_v37  ;;  %v2649_v51 = vpack.c.bf16 %v1548_v46, %v1542_v25  ;;  %v2651_v39 = vpack.c.bf16 %v1547_v40, %v1541_v22  ;;  %v3697_v57 = vmax.f32 %v1475_v8, 0.0  ;;  %v2653_v59 = vpack.c.bf16 %v1560_v19, %v1554_v55  ;;  %v1590_v36 = vld [vmem:[#allocation8 + $0x2c8] sm:$0xff]  ;;  %v1589_v61 = vld [vmem:[#allocation8 + $0x2c0] sm:$0xff]  ;;  %v1608_v25 = vld [vmem:[#allocation8 + $0x358] sm:$0xff] }
 0x952   :  { %2644 = vmatpush1.bf16.msra.mxu0 %v2643_v45  ;;  %1769 = vmatprep.mubr.f32.mxu0 %v3673_v11  ;;  %v3684_v49 = vadd.f32 %v1464_v34, %v1446_v5  ;;  %v3689_v53 = vadd.f32 %v1460_v6, %v1445_v14  ;;  %v3699_v26 = vmax.f32 %v1478_v52, 0.0  ;;  %v2655_v32 = vpack.c.bf16 %v1559_v60, %v1553_v27  ;;  %v1584_v45 = vld [vmem:[#allocation8 + $0x298] sm:$0xff]  ;;  %v1583_v6 = vld [vmem:[#allocation8 + $0x290] sm:$0xff]  ;;  %v1601_v5 = vld [vmem:[#allocation8 + $0x320] sm:$0xff] }
 0x953   :  { %1882 = vmatprep.mubr.f32.mxu1 %v3673_v11  ;;  %2646 = vmatprep.subr.bf16.mxu0 %v2645_v21  ;;  %v3705_v0 = vmax.f32 %v1477_v42, 0.0  ;;  %v2657_v2 = vpack.c.bf16 %v1572_v63, %v1566_v62  ;;  %v3707_v8 = vmax.f32 %v1480_v44, 0.0  ;;  %v2659_v21 = vpack.c.bf16 %v1571_v38, %v1565_v1  ;;  %v1596_v52 = vld [vmem:[#allocation8 + $0x2f8] sm:$0xff]  ;;  %v1595_v42 = vld [vmem:[#allocation8 + $0x2f0] sm:$0xff]  ;;  %v1613_v40 = vld [vmem:[#allocation8 + $0x380] sm:$0xff] }
 0x954   :  { %v3713_v43 = vmax.f32 %v1479_v58, 0.0  ;;  %v2661_v34 = vpack.c.bf16 %v1584_v45, %v1578_v31  ;;  %v3715_v3 = vmax.f32 %v1482_v47, 0.0  ;;  %v2663_v10 = vpack.c.bf16 %v1583_v6, %v1577_v35  ;;  %v1602_v58 = vld [vmem:[#allocation8 + $0x328] sm:$0xff]  ;;  %v1607_v14 = vld [vmem:[#allocation8 + $0x350] sm:$0xff]  ;;  %v1625_v27 = vld [vmem:[#allocation8 + $0x3e0] sm:$0xff] }
 0x955   :  { %1770 = vmatmul.mubr.f32.gmra.mrb[54].mxu0 %v3687_v12  ;;  %1883 = vmatmul.mubr.f32.gmra.mrb[28].mxu1 %v3687_v12  ;;  %v3722_v50 = vmax.f32 %v3675_v56, 0.0  ;;  %v2665_v41 = vpack.c.bf16 %v1596_v52, %v1590_v36  ;;  %v3725_v44 = vmax.f32 %v3684_v49, 0.0  ;;  %v2667_v46 = vpack.c.bf16 %v1595_v42, %v1589_v61  ;;  %v1620_v49 = vld [vmem:[#allocation8 + $0x3b8] sm:$0xff]  ;;  %v1619_v55 = vld [vmem:[#allocation8 + $0x3b0] sm:$0xff]  ;;  %v1626_v19 = vld [vmem:[#allocation8 + $0x3e8] sm:$0xff] }
 0x956   :  { %2648 = vmatpush1.bf16.msra.mxu0 %v2647_v48  ;;  %1775 = vmatprep.mubr.f32.mxu0 %v3691_v54  ;;  %v3732_v47 = vmax.f32 %v3689_v53, 0.0  ;;  %v2669_v56 = vpack.c.bf16 %v1608_v25, %v1602_v58  ;;  %v1614_v48 = vld [vmem:[#allocation8 + $0x388] sm:$0xff]  ;;  %v1632_v53 = vld [vmem:[#allocation8 + $0x418] sm:$0xff]  ;;  %v1631_v60 = vld [vmem:[#allocation8 + $0x410] sm:$0xff] }
 0x957   :  { %1888 = vmatprep.mubr.f32.mxu1 %v3691_v54  ;;  %2650 = vmatprep.subr.bf16.mxu0 %v2649_v51  ;;  %v2671_v51 = vpack.c.bf16 %v1607_v14, %v1601_v5  ;;  %v2673_v22 = vpack.c.bf16 %v1620_v49, %v1614_v48  ;;  %v1638_v62 = vld [vmem:[#allocation8 + $0x448] sm:$0xff]  ;;  %v1644_v63 = vld [vmem:[#allocation8 + $0x478] sm:$0xff]  ;;  %v1643_v1 = vld [vmem:[#allocation8 + $0x470] sm:$0xff] }
 0x958   :  { %v1650_v38 = vld [vmem:[#allocation8 + $0x4a8] sm:$0xff]  ;;  %v1656_v31 = vld [vmem:[#allocation8 + $0x4d8] sm:$0xff]  ;;  %v1655_v35 = vld [vmem:[#allocation8 + $0x4d0] sm:$0xff] }
 0x959   :  { %1776 = vmatmul.mubr.f32.gmra.mrb[56].mxu0 %v3697_v57  ;;  %1889 = vmatmul.mubr.f32.gmra.mrb[30].mxu1 %v3697_v57  ;;  %v1662_v6 = vld [vmem:[#allocation8 + $0x508] sm:$0xff]  ;;  %v1668_v36 = vld [vmem:[#allocation8 + $0x538] sm:$0xff]  ;;  %v1667_v61 = vld [vmem:[#allocation8 + $0x530] sm:$0xff] }
 0x95a   :  { %2652 = vmatpush1.bf16.msra.mxu0 %v2651_v39  ;;  %1781 = vmatprep.mubr.f32.mxu0 %v3699_v26  ;;  %v2675_v39 = vpack.c.bf16 %v1619_v55, %v1613_v40  ;;  %v1674_v42 = vld [vmem:[#allocation8 + $0x568] sm:$0xff]  ;;  %v1680_v58 = vld [vmem:[#allocation8 + $0x598] sm:$0xff]  ;;  %v1679_v5 = vld [vmem:[#allocation8 + $0x590] sm:$0xff] }
 0x95b   :  { %1894 = vmatprep.mubr.f32.mxu1 %v3699_v26  ;;  %2654 = vmatprep.subr.bf16.mxu0 %v2653_v59  ;;  %v2677_v59 = vpack.c.bf16 %v1632_v53, %v1626_v19  ;;  %v1686_v14 = vld [vmem:[#allocation8 + $0x5c8] sm:$0xff]  ;;  %v1692_v48 = vld [vmem:[#allocation8 + $0x5f8] sm:$0xff]  ;;  %v1691_v40 = vld [vmem:[#allocation8 + $0x5f0] sm:$0xff]  ;;  %v3741_v19 = vpop.f32.mrb[44].mxu0 }
 0x95c   :  { %v3743_v53 = vpop.f32.mrb[45].mxu0 }
 0x95d   :  { %1782 = vmatmul.mubr.f32.gmra.mrb[58].mxu0 %v3705_v0  ;;  %1895 = vmatmul.mubr.f32.gmra.mrb[32].mxu1 %v3705_v0 }
 0x95e   :  { %2656 = vmatpush1.bf16.msra.mxu0 %v2655_v32  ;;  %1787 = vmatprep.mubr.f32.mxu0 %v3707_v8  ;;  %v2679_v32 = vpack.c.bf16 %v1631_v60, %v1625_v27 }
 0x95f   :  { %1900 = vmatprep.mubr.f32.mxu1 %v3707_v8  ;;  %2658 = vmatprep.subr.bf16.mxu0 %v2657_v2  ;;  %v2681_v2 = vpack.c.bf16 %v1644_v63, %v1638_v62 }
 0x961   :  { %1788 = vmatmul.mubr.f32.gmra.mrb[60].mxu0 %v3713_v43  ;;  %1901 = vmatmul.mubr.f32.gmra.mrb[34].mxu1 %v3713_v43 }
 0x962   :  { %2660 = vmatpush1.bf16.msra.mxu0 %v2659_v21  ;;  %1793 = vmatprep.mubr.f32.mxu0 %v3715_v3  ;;  %v2685_v21 = vpack.c.bf16 %v1656_v31, %v1650_v38 }
 0x963   :  { %1906 = vmatprep.mubr.f32.mxu1 %v3715_v3  ;;  %2662 = vmatprep.subr.bf16.mxu0 %v2661_v34  ;;  %v1649_v34 = vld [vmem:[#allocation8 + $0x4a0] sm:$0xff] }
 0x964   :  { %v2687_v52 = vpack.c.bf16 %v1655_v35, %v1649_v34 }
 0x965   :  { %1794 = vmatmul.mubr.f32.gmra.mrb[62].mxu0 %v3722_v50  ;;  %1907 = vmatmul.mubr.f32.gmra.mrb[36].mxu1 %v3722_v50 }
 0x966   :  { %2664 = vmatpush1.bf16.msra.mxu0 %v2663_v10  ;;  %1799 = vmatprep.mubr.f32.mxu0 %v3725_v44  ;;  %v2689_v10 = vpack.c.bf16 %v1668_v36, %v1662_v6 }
 0x967   :  { %1912 = vmatprep.mubr.f32.mxu1 %v3725_v44  ;;  %2666 = vmatprep.subr.bf16.mxu0 %v2665_v41  ;;  %v1661_v41 = vld [vmem:[#allocation8 + $0x500] sm:$0xff] }
 0x968   :  { %v2691_v25 = vpack.c.bf16 %v1667_v61, %v1661_v41 }
 0x969   :  { %1800 = vmatmul.mubr.f32.gmra.mrb[64].mxu0 %v3732_v47  ;;  %1913 = vmatmul.mubr.f32.gmra.mrb[38].mxu1 %v3732_v47 }
 0x96a   :  { %2668 = vmatpush1.bf16.msra.mxu0 %v2667_v46  ;;  %1983 = vmatprep.mubr.f32.mxu0 %v3645_v28  ;;  %v1637_v28 = vld [vmem:[#allocation8 + $0x440] sm:$0xff]  ;;  %v2693_v46 = vpack.c.bf16 %v1680_v58, %v1674_v42 }
 0x96b   :  { %2670 = vmatprep.subr.bf16.mxu0 %v2669_v56  ;;  %v2683_v45 = vpack.c.bf16 %v1643_v1, %v1637_v28  ;;  %v1673_v56 = vld [vmem:[#allocation8 + $0x560] sm:$0xff] }
 0x96c   :  { %v2695_v49 = vpack.c.bf16 %v1679_v5, %v1673_v56 }
 0x96e   :  { %2672 = vmatpush1.bf16.msra.mxu0 %v2671_v51  ;;  %v2697_v51 = vpack.c.bf16 %v1692_v48, %v1686_v14 }
 0x96f   :  { %2674 = vmatprep.subr.bf16.mxu0 %v2673_v22  ;;  %v1685_v22 = vld [vmem:[#allocation8 + $0x5c0] sm:$0xff] }
 0x970   :  { %v2699_v55 = vpack.c.bf16 %v1691_v40, %v1685_v22 }
 0x972   :  { %2676 = vmatpush1.bf16.msra.mxu0 %v2675_v39  ;;  %v3747_v39 = vpop.f32.mrb[46].mxu0 }
 0x973   :  { %2678 = vmatprep.subr.bf16.mxu0 %v2677_v59  ;;  %v3749_v59 = vpop.f32.mrb[47].mxu0 }
 0x976   :  { %2680 = vmatpush1.bf16.msra.mxu0 %v2679_v32 }
 0x977   :  { %2682 = vmatprep.subr.bf16.mxu0 %v2681_v2 }
 0x97a   :  { %2684 = vmatpush1.bf16.msra.mxu0 %v2683_v45 }
 0x97b   :  { %2686 = vmatprep.subr.bf16.mxu0 %v2685_v21 }
 0x97e   :  { %2688 = vmatpush1.bf16.msra.mxu0 %v2687_v52 }
 0x97f   :  { %2690 = vmatprep.subr.bf16.mxu0 %v2689_v10 }
 0x982   :  { %2692 = vmatpush1.bf16.msra.mxu0 %v2691_v25 }
 0x983   :  { %2694 = vmatprep.subr.bf16.mxu0 %v2693_v46 }
 0x986   :  { %2696 = vmatpush1.bf16.msra.mxu0 %v2695_v49 }
 0x987   :  { %2698 = vmatprep.subr.bf16.mxu0 %v2697_v51 }
 0x98a   :  { %2700 = vmatpush1.bf16.msra.mxu0 %v2699_v55 }
 0x98d   :  { %1984 = vmatmul.mubr.f32.vlgmr.msra.gmra.mrb[66].mxu0 %v3647_v9  ;;  %v3753_v9 = vpop.f32.mrb[48].mxu0 }
 0x98e   :  { %1989 = vmatprep.mubr.f32.mxu0 %v3651_v33  ;;  %v3755_v33 = vpop.f32.mrb[49].mxu0 }
 0x991   :  { %1990 = vmatmul.mubr.f32.gmra.mrb[68].mxu0 %v3671_v37  ;;  %v2033_v37 = vld [vmem:[#allocation10 + $0x8] sm:$0xff] }
 0x992   :  { %1995 = vmatprep.mubr.f32.mxu0 %v3673_v11  ;;  %2269 = vmatprep.mubr.msk.f32.mxu1 %vm195_vm1, %v2033_v37 }
 0x995   :  { %1996 = vmatmul.mubr.f32.gmra.mrb[70].mxu0 %v3687_v12 }
 0x996   :  { %2001 = vmatprep.mubr.f32.mxu0 %v3691_v54 }
 0x999   :  { %2002 = vmatmul.mubr.f32.gmra.mrb[72].mxu0 %v3697_v57 }
 0x99a   :  { %2007 = vmatprep.mubr.f32.mxu0 %v3699_v26 }
 0x99d   :  { %2008 = vmatmul.mubr.f32.gmra.mrb[74].mxu0 %v3705_v0 }
 0x99e   :  { %2013 = vmatprep.mubr.f32.mxu0 %v3707_v8 }
 0x9a1   :  { %2014 = vmatmul.mubr.f32.gmra.mrb[76].mxu0 %v3713_v43 }
 0x9a2   :  { %2019 = vmatprep.mubr.f32.mxu0 %v3715_v3 }
 0x9a5   :  { %2020 = vmatmul.mubr.f32.gmra.mrb[78].mxu0 %v3722_v50 }
 0x9a6   :  { %2025 = vmatprep.mubr.f32.mxu0 %v3725_v44 }
 0x9a9   :  { %2026 = vmatmul.mubr.f32.gmra.mrb[80].mxu0 %v3732_v47 }
 0xa20   :  { %v1759_v11 = vpop.f32.mrb[50].mxu0  ;;  %v1872_v12 = vpop.f32.mrb[24].mxu1 }
 0xa21   :  { %v1761_v54 = vpop.f32.mrb[51].mxu0  ;;  %v1874_v57 = vpop.f32.mrb[25].mxu1 }
 0xa24   :  { %v1765_v26 = vpop.f32.mrb[52].mxu0  ;;  %v1878_v0 = vpop.f32.mrb[26].mxu1 }
 0xa25   :  { %v2703_v8 = vpack.c.bf16 %v1765_v26, %v1759_v11  ;;  %v2719_v27 = vpack.c.bf16 %v1878_v0, %v1872_v12  ;;  %v1767_v43 = vpop.f32.mrb[53].mxu0  ;;  %v1880_v60 = vpop.f32.mrb[27].mxu1 }
 0xa26   :  { %v2701_v3 = vpack.c.bf16 %v1767_v43, %v1761_v54  ;;  %v2717_v62 = vpack.c.bf16 %v1880_v60, %v1874_v57 }
 0xa28   :  { %v1771_v50 = vpop.f32.mrb[54].mxu0  ;;  %v1884_v63 = vpop.f32.mrb[28].mxu1  ;;  %2702 = vmatprep.subr.bf16.mxu1 %v2701_v3 }
 0xa29   :  { %v1773_v44 = vpop.f32.mrb[55].mxu0  ;;  %v1886_v47 = vpop.f32.mrb[29].mxu1  ;;  %2704 = vmatpush1.bf16.msra.mxu1 %v2703_v8 }
 0xa2c   :  { %v1777_v32 = vpop.f32.mrb[56].mxu0  ;;  %v1890_v2 = vpop.f32.mrb[30].mxu1 }
 0xa2d   :  { %v2707_v28 = vpack.c.bf16 %v1777_v32, %v1771_v50  ;;  %v2723_v1 = vpack.c.bf16 %v1890_v2, %v1884_v63  ;;  %v1779_v38 = vpop.f32.mrb[57].mxu0  ;;  %v1892_v31 = vpop.f32.mrb[31].mxu1 }
 0xa2e   :  { %v2705_v45 = vpack.c.bf16 %v1779_v38, %v1773_v44  ;;  %v2721_v21 = vpack.c.bf16 %v1892_v31, %v1886_v47 }
 0xa30   :  { %v1783_v34 = vpop.f32.mrb[58].mxu0  ;;  %v1896_v35 = vpop.f32.mrb[32].mxu1  ;;  %2706 = vmatprep.subr.bf16.mxu1 %v2705_v45 }
 0xa31   :  { %v1785_v6 = vpop.f32.mrb[59].mxu0  ;;  %v1898_v36 = vpop.f32.mrb[33].mxu1  ;;  %2708 = vmatpush1.bf16.msra.mxu1 %v2707_v28 }
 0xa34   :  { %v1789_v52 = vpop.f32.mrb[60].mxu0  ;;  %v1902_v10 = vpop.f32.mrb[34].mxu1 }
 0xa35   :  { %v2711_v41 = vpack.c.bf16 %v1789_v52, %v1783_v34  ;;  %v2727_v61 = vpack.c.bf16 %v1902_v10, %v1896_v35  ;;  %v1791_v42 = vpop.f32.mrb[61].mxu0  ;;  %v1904_v58 = vpop.f32.mrb[35].mxu1  ;;  %v2034_v52 = vld [vmem:[#allocation10 + $0x10] sm:$0xff]  ;;  %v2037_v10 = vld [vmem:[#allocation10 + $0x28] sm:$0xff] }
 0xa36   :  { %v2709_v25 = vpack.c.bf16 %v1791_v42, %v1785_v6  ;;  %v2725_v46 = vpack.c.bf16 %v1904_v58, %v1898_v36  ;;  %v2032_v6 = vld [vmem:[#allocation10] sm:$0xff]  ;;  %v2035_v36 = vld [vmem:[#allocation10 + $0x18] sm:$0xff]  ;;  %v2038_v42 = vld [vmem:[#allocation10 + $0x30] sm:$0xff] }
 0xa37   :  { %v2041_v58 = vld [vmem:[#allocation10 + $0x48] sm:$0xff] }
 0xa38   :  { %v1795_v56 = vpop.f32.mrb[62].mxu0  ;;  %v1908_v5 = vpop.f32.mrb[36].mxu1  ;;  %2710 = vmatprep.subr.bf16.mxu1 %v2709_v25  ;;  %v2040_v25 = vld [vmem:[#allocation10 + $0x40] sm:$0xff] }
 0xa39   :  { %v1797_v14 = vpop.f32.mrb[63].mxu0  ;;  %v1910_v48 = vpop.f32.mrb[37].mxu1  ;;  %2712 = vmatpush1.bf16.msra.mxu1 %v2711_v41  ;;  %v2036_v41 = vld [vmem:[#allocation10 + $0x20] sm:$0xff] }
 0xa3c   :  { %v1801_v49 = vpop.f32.mrb[64].mxu0  ;;  %v1914_v51 = vpop.f32.mrb[38].mxu1 }
 0xa3d   :  { %v2715_v22 = vpack.c.bf16 %v1801_v49, %v1795_v56  ;;  %v2731_v40 = vpack.c.bf16 %v1914_v51, %v1908_v5  ;;  %v1803_v55 = vpop.f32.mrb[65].mxu0  ;;  %v1916_v37 = vpop.f32.mrb[39].mxu1  ;;  %v2042_v56 = vld [vmem:[#allocation10 + $0x50] sm:$0xff]  ;;  %v2045_v5 = vld [vmem:[#allocation10 + $0x68] sm:$0xff] }
 0xa3e   :  { %v2713_v11 = vpack.c.bf16 %v1803_v55, %v1797_v14  ;;  %v2729_v12 = vpack.c.bf16 %v1916_v37, %v1910_v48  ;;  %v2044_v14 = vld [vmem:[#allocation10 + $0x60] sm:$0xff]  ;;  %v2047_v48 = vld [vmem:[#allocation10 + $0x78] sm:$0xff]  ;;  %v2046_v49 = vld [vmem:[#allocation10 + $0x70] sm:$0xff] }
 0xa3f   :  { %v2185_v51 = vld [vmem:[%s3840_s12] sm:$0x3]  ;;  %s2946_s12 = smov [#allocation11]  }
 0xa40   :  { %2714 = vmatprep.subr.bf16.mxu1 %v2713_v11  ;;  %v3779_v55 = vrot.slane %v2185_v51, %v3185_v4  ;;  %s2234_s15 = sshll.u32 %s2946_s12, 4  ;;  %s2235_s15 = int_to_ptr.vmem [resolvable:$true] %s2234_s15 }
 0xa41   :  { %2716 = vmatpush1.bf16.msra.mxu1 %v2715_v22  ;;  %v3776_v22 = vrot.slane %v2185_v51, %v3194_v7  ;;  %s2898_s10 = scalar_lea.vmem %s2235_s15, 2048  ;;  %p2903_p13 = scmp.lt.s32.totalorder %s2235_s15, %s2235_s15 }
 0xa42   :  { %2718 = vmatprep.subr.bf16.mxu1 %v2717_v62  ;;  %p2899_p12 = scmp.ne.s32.totalorder %s2235_s15, %s2898_s10  ;;  %p2904_p0 = scmp.lt.s32.totalorder %s2898_s10, %s2898_s10 }
 0xa44   :  { %p2905_p1 = por %p2904_p0, %p2903_p13 }
 0xa45   :  { %2720 = vmatpush1.bf16.msra.mxu1 %v2719_v27 }
 0xa46   :  { %2722 = vmatprep.subr.bf16.mxu1 %v2721_v21  ;;  %p2906_p2 = pnand %p2905_p1, %p2899_p12 }
 0xa49   :  { %2724 = vmatpush1.bf16.msra.mxu1 %v2723_v1 }
 0xa4a   :  { %2726 = vmatprep.subr.bf16.mxu1 %v2725_v46  ;;  %v2043_v46 = vld [vmem:[#allocation10 + $0x58] sm:$0xff] }
 0xa4d   :  { %2728 = vmatpush1.bf16.msra.mxu1 %v2727_v61  ;;  %v2039_v61 = vld [vmem:[#allocation10 + $0x38] sm:$0xff] }
 0xa4e   :  { %2730 = vmatprep.subr.bf16.mxu1 %v2729_v12 }
 0xa51   :  { %2732 = vmatpush1.bf16.msra.mxu1 %v2731_v40 }
 0xa60   :  { %v1985_v54 = vpop.f32.mrb[66].mxu0 }
 0xa61   :  { %v1987_v57 = vpop.f32.mrb[67].mxu0 }
 0xa64   :  { %v1991_v26 = vpop.f32.mrb[68].mxu0 }
 0xa65   :  { %v2735_v0 = vpack.c.bf16 %v1991_v26, %v1985_v54  ;;  %v1993_v8 = vpop.f32.mrb[69].mxu0 }
 0xa66   :  { %v2733_v43 = vpack.c.bf16 %v1993_v8, %v1987_v57 }
 0xa68   :  { %v1997_v60 = vpop.f32.mrb[70].mxu0  ;;  %2734 = vmatprep.subr.bf16.mxu1 %v2733_v43 }
 0xa69   :  { %v1999_v3 = vpop.f32.mrb[71].mxu0  ;;  %2736 = vmatpush1.bf16.msra.mxu1 %v2735_v0 }
 0xa6c   :  { %v2003_v50 = vpop.f32.mrb[72].mxu0 }
 0xa6d   :  { %v2739_v63 = vpack.c.bf16 %v2003_v50, %v1997_v60  ;;  %v2005_v62 = vpop.f32.mrb[73].mxu0 }
 0xa6e   :  { %v2737_v27 = vpack.c.bf16 %v2005_v62, %v1999_v3 }
 0xa70   :  { %v2009_v44 = vpop.f32.mrb[74].mxu0  ;;  %2738 = vmatprep.subr.bf16.mxu1 %v2737_v27 }
 0xa71   :  { %v2011_v47 = vpop.f32.mrb[75].mxu0  ;;  %2740 = vmatpush1.bf16.msra.mxu1 %v2739_v63 }
 0xa74   :  { %v2015_v32 = vpop.f32.mrb[76].mxu0 }
 0xa75   :  { %v2743_v2 = vpack.c.bf16 %v2015_v32, %v2009_v44  ;;  %v2017_v28 = vpop.f32.mrb[77].mxu0 }
 0xa76   :  { %v2741_v1 = vpack.c.bf16 %v2017_v28, %v2011_v47 }
 0xa78   :  { %v2021_v38 = vpop.f32.mrb[78].mxu0  ;;  %2742 = vmatprep.subr.bf16.mxu1 %v2741_v1 }
 0xa79   :  { %v2023_v31 = vpop.f32.mrb[79].mxu0  ;;  %2744 = vmatpush1.bf16.msra.mxu1 %v2743_v2 }
 0xa7c   :  { %v2027_v45 = vpop.f32.mrb[80].mxu0 }
 0xa7d   :  { %v2747_v21 = vpack.c.bf16 %v2027_v45, %v2021_v38  ;;  %v2029_v34 = vpop.f32.mrb[81].mxu0 }
 0xa7e   :  { %v2745_v35 = vpack.c.bf16 %v2029_v34, %v2023_v31 }
 0xa80   :  { %2746 = vmatprep.subr.bf16.mxu1 %v2745_v35 }
 0xa81   :  { %2748 = vmatpush1.bf16.msra.mxu1 %v2747_v21 }
 0xa84   :  { %2137 = vmatmul.mubr.f32.vlgmr.msra.gmra.mrb[40].mxu1 %v2032_v6 }
 0xa85   :  { %2270 = vmatprep.mubr.msk.f32.mxu1 %vm195_vm1, %v2035_v36 }
 0xa88   :  { %2143 = vmatmul.mubr.f32.gmra.mrb[42].mxu1 %v2034_v52 }
 0xa89   :  { %2271 = vmatprep.mubr.msk.f32.mxu1 %vm195_vm1, %v2037_v10 }
 0xa8c   :  { %2149 = vmatmul.mubr.f32.gmra.mrb[44].mxu1 %v2036_v41 }
 0xa8d   :  { %2272 = vmatprep.mubr.msk.f32.mxu1 %vm195_vm1, %v2039_v61 }
 0xa90   :  { %2155 = vmatmul.mubr.f32.gmra.mrb[46].mxu1 %v2038_v42 }
 0xa91   :  { %2273 = vmatprep.mubr.msk.f32.mxu1 %vm195_vm1, %v2041_v58 }
 0xa94   :  { %2161 = vmatmul.mubr.f32.gmra.mrb[48].mxu1 %v2040_v25 }
 0xa95   :  { %2274 = vmatprep.mubr.msk.f32.mxu1 %vm195_vm1, %v2043_v46 }
 0xa98   :  { %2167 = vmatmul.mubr.f32.gmra.mrb[50].mxu1 %v2042_v56 }
 0xa99   :  { %2275 = vmatprep.mubr.msk.f32.mxu1 %vm195_vm1, %v2045_v5 }
 0xa9c   :  { %2173 = vmatmul.mubr.f32.gmra.mrb[52].mxu1 %v2044_v14 }
 0xa9d   :  { %2276 = vmatprep.mubr.msk.f32.mxu1 %vm195_vm1, %v2047_v48 }
 0xaa0   :  { %2179 = vmatmul.mubr.f32.gmra.mrb[54].mxu1 %v2046_v49 }
 0xb57   :  { %v2138_v40 = vpop.f32.mrb[40].mxu1 }
 0xb58   :  { %v2139_v37 = vadd.f32 %v2138_v40, %v3604_v13  ;;  %v2140_v11 = vpop.f32.mrb[41].mxu1 }
 0xb59   :  { %v2141_v12 = vadd.f32 %v2140_v11, %v3606_v15 }
 0xb5a   :  { %v2197_v54 = vadd.f32 %v3776_v22, %v2139_v37 }
 0xb5b   :  { %v2198_v57 = vadd.f32 %v3779_v55, %v2141_v12  ;;  %v2144_v26 = vpop.f32.mrb[42].mxu1 }
 0xb5c   :  { %2213 = vst [vmem:[#allocation11] sm:$0xff] %v2197_v54  ;;  %v2145_v0 = vadd.f32 %v2144_v26, %v3608_v16  ;;  %v2146_v8 = vpop.f32.mrb[43].mxu1 }
 0xb5d   :  { %2214 = vst [vmem:[#allocation11 + $0x8] sm:$0xff] %v2198_v57  ;;  %v2147_v7 = vadd.f32 %v2146_v8, %v3610_v17 }
 0xb5e   :  { %v2199_v4 = vadd.f32 %v3776_v22, %v2145_v0 }
 0xb5f   :  { %v2200_v43 = vadd.f32 %v3779_v55, %v2147_v7  ;;  %v2150_v13 = vpop.f32.mrb[44].mxu1 }
 0xb60   :  { %2215 = vst [vmem:[#allocation11 + $0x10] sm:$0xff] %v2199_v4  ;;  %v2151_v15 = vadd.f32 %v2150_v13, %v3612_v18  ;;  %v2152_v60 = vpop.f32.mrb[45].mxu1 }
 0xb61   :  { %2216 = vst [vmem:[#allocation11 + $0x18] sm:$0xff] %v2200_v43  ;;  %v2153_v3 = vadd.f32 %v2152_v60, %v3614_v20 }
 0xb62   :  { %v2201_v50 = vadd.f32 %v3776_v22, %v2151_v15 }
 0xb63   :  { %v2202_v16 = vadd.f32 %v3779_v55, %v2153_v3  ;;  %v2156_v63 = vpop.f32.mrb[46].mxu1 }
 0xb64   :  { %2217 = vst [vmem:[#allocation11 + $0x20] sm:$0xff] %v2201_v50  ;;  %v2157_v17 = vadd.f32 %v2156_v63, %v3616_v23  ;;  %v2158_v62 = vpop.f32.mrb[47].mxu1 }
 0xb65   :  { %2218 = vst [vmem:[#allocation11 + $0x28] sm:$0xff] %v2202_v16  ;;  %v2159_v27 = vadd.f32 %v2158_v62, %v3618_v24 }
 0xb66   :  { %v2203_v44 = vadd.f32 %v3776_v22, %v2157_v17 }
 0xb67   :  { %v2204_v18 = vadd.f32 %v3779_v55, %v2159_v27  ;;  %v2162_v47 = vpop.f32.mrb[48].mxu1 }
 0xb68   :  { %2219 = vst [vmem:[#allocation11 + $0x30] sm:$0xff] %v2203_v44  ;;  %v2163_v20 = vadd.f32 %v2162_v47, %v3620_v29  ;;  %v2164_v32 = vpop.f32.mrb[49].mxu1 }
 0xb69   :  { %2220 = vst [vmem:[#allocation11 + $0x38] sm:$0xff] %v2204_v18  ;;  %v2165_v2 = vadd.f32 %v2164_v32, %v3622_v30 }
 0xb6a   :  { %v2205_v28 = vadd.f32 %v3776_v22, %v2163_v20 }
 0xb6b   :  { %v2206_v23 = vadd.f32 %v3779_v55, %v2165_v2  ;;  %v2168_v1 = vpop.f32.mrb[50].mxu1 }
 0xb6c   :  { %2221 = vst [vmem:[#allocation11 + $0x40] sm:$0xff] %v2205_v28  ;;  %v2169_v24 = vadd.f32 %v2168_v1, %v3741_v19  ;;  %v2170_v38 = vpop.f32.mrb[51].mxu1 }
 0xb6d   :  { %2222 = vst [vmem:[#allocation11 + $0x48] sm:$0xff] %v2206_v23  ;;  %v2171_v31 = vadd.f32 %v2170_v38, %v3743_v53 }
 0xb6e   :  { %v2207_v45 = vadd.f32 %v3776_v22, %v2169_v24 }
 0xb6f   :  { %v2208_v29 = vadd.f32 %v3779_v55, %v2171_v31  ;;  %v2174_v21 = vpop.f32.mrb[52].mxu1 }
 0xb70   :  { %2223 = vst [vmem:[#allocation11 + $0x50] sm:$0xff] %v2207_v45  ;;  %v2175_v30 = vadd.f32 %v2174_v21, %v3747_v39  ;;  %v2176_v34 = vpop.f32.mrb[53].mxu1 }
 0xb71   :  { %2224 = vst [vmem:[#allocation11 + $0x58] sm:$0xff] %v2208_v29  ;;  %v2177_v35 = vadd.f32 %v2176_v34, %v3749_v59 }
 0xb72   :  { %v2209_v6 = vadd.f32 %v3776_v22, %v2175_v30 }
 0xb73   :  { %v2210_v19 = vadd.f32 %v3779_v55, %v2177_v35  ;;  %v2180_v36 = vpop.f32.mrb[54].mxu1 }
 0xb74   :  { %2225 = vst [vmem:[#allocation11 + $0x60] sm:$0xff] %v2209_v6  ;;  %v2181_v53 = vadd.f32 %v2180_v36, %v3753_v9  ;;  %v2182_v52 = vpop.f32.mrb[55].mxu1 }
 0xb75   :  { %2226 = vst [vmem:[#allocation11 + $0x68] sm:$0xff] %v2210_v19  ;;  %v2183_v10 = vadd.f32 %v2182_v52, %v3755_v33 }
 0xb76   :  { %v2211_v39 = vadd.f32 %v3776_v22, %v2181_v53 }
 0xb77   :  { %v2212_v41 = vadd.f32 %v3779_v55, %v2183_v10 }
 0xb78   :  { %2227 = vst [vmem:[#allocation11 + $0x70] sm:$0xff] %v2211_v39 }
 0xb79   :  { %2228 = vst [vmem:[#allocation11 + $0x78] sm:$0xff] %v2212_v41 }
 0xb7a   :  { %2909 = shalt.err (!%p2906_p2)
}
 0xb7b   :  { %s2910_s2 = scalar_lea.hbm %s3841_s13, 2048 }
 0xb7c   :  { %p2911_p3 = scmp.ne.s32.totalorder %s3841_s13, %s2910_s2  ;;  %p2914_p4 = scmp.lt.u32.totalorder %s2910_s2, %s3841_s13 }
 0xb7e   :  { %p2916_p5 = pnand %p2914_p4, %p2911_p3 }
 0xb80   :  { %2919 = shalt.err (!%p2916_p5)
}
 0xb81   :  { %2240 = dma.vmem_to_hbm [thread:$0]  %s2235_s15, 2048, %s3841_s13, [#allocation4], %s2929_s18, %s2929_s18, %s2930_s19  }
 0xb82   :  { %2926 = dma.done.wait [#allocation4], 2048  }
 0xb83   :  { %2927 = vsyncadd [#allocation4], 4294965248 }
 0xb84   :  { %2244 = vsyncpa [#allocation3], 1 }
 0xb85   :  { %2245 = vsyncpa [#allocation6], 1 }
 0xb86   :  { %2246 = vsyncpa [#allocation9], 1 }
 0xb87   :  { %2247 = vsyncpa [#allocation4], 1 }

</bundles_post_ra>
